<compile_context>
chip_gen: v5e
topology: v5e:2x2
jax: 0.10.0
libtpu: 0.0.40
codegen_flags: <defaults>
</compile_context>

<pallas_src>
import functools

import numpy as np
import jax
import jax.numpy as jnp
from jax.experimental import pallas as pl
from jax.experimental.pallas import tpu as pltpu


# ------------------------------ helpers ------------------------------------

def _round_up(x, m):
    return ((x + m - 1) // m) * m


def _pick_tile(n_pad, cap):
    for t in (1024, 512, 256, 128):
        if t <= cap and n_pad % t == 0:
            return t
    return 128


def _vmem_limit_bytes(n_p, env_p, tm, tk):
    a = 2 * tm * tk * 2            # double-buffered bf16 A tiles
    h = 2 * n_p * env_p * 2        # resident bf16 h (conservatively x2)
    w = env_p * env_p * 2          # resident bf16 layer weight
    o = 2 * tm * env_p * 2         # double-buffered bf16 output tiles
    acc = tm * env_p * 4           # f32 accumulator scratch
    need = a + h + w + o + acc
    # 1.5x headroom for small residents + compiler scratch; never ask for more
    # than v7x's 64 MiB physical VMEM (v5e/v6e have 128 MiB so 64 is safe too).
    return int(min(max(need * 3 // 2, 32 * 1024 * 1024), 64 * 1024 * 1024))


def _layernorm(x, gamma, beta, d_valid, eps=1e-5):
    # Two-pass (PyTorch-style) stats over the true feature count. Padded lanes
    # are masked out of the variance and come out exactly 0 because gamma/beta
    # are zero-padded, so lane padding stays exactly zero through the network.
    inv_d = 1.0 / float(d_valid)
    lane = jax.lax.broadcasted_iota(jnp.int32, x.shape, x.ndim - 1)
    mask = lane < d_valid
    mean = jnp.sum(x, axis=-1, keepdims=True) * inv_d
    cent = jnp.where(mask, x - mean, 0.0)
    var = jnp.sum(cent * cent, axis=-1, keepdims=True) * inv_d
    return cent * jax.lax.rsqrt(var + eps) * gamma + beta


# ------------------------------ kernels ------------------------------------

def _encoder_kernel(x_ref, w_ref, b_ref, g_ref, be_ref, o_ref, *, d_valid):
    # h1 = LayerNorm(relu(x @ W_enc + b_enc))   (dropout = identity in eval)
    y = jnp.dot(x_ref[...], w_ref[...], preferred_element_type=jnp.float32)
    y = jnp.maximum(y + b_ref[...], 0.0)
    o_ref[...] = _layernorm(y, g_ref[...], be_ref[...], d_valid).astype(o_ref.dtype)


def _gnn_layer_kernel(kblk_ref, nblk_ref, a_ref, h_ref, w_ref, b_ref, g_ref,
                      be_ref, o_ref, acc_ref, *, d_valid, tm, tk, max_nnz):
    # grid = (row blocks i [parallel], nonzero k-blocks of this row [arbitrary])
    i = pl.program_id(0)
    k = pl.program_id(1)

    @pl.when(k == 0)
    def _():
        acc_ref[...] = jnp.zeros_like(acc_ref)

    # Only accumulate real nonzero A tiles; tail steps (k >= nblk) are skipped.
    @pl.when(k < nblk_ref[i])
    def _():
        kb = kblk_ref[i * max_nnz + k]
        hk = h_ref[pl.ds(pl.multiple_of(kb * tk, tk), tk), :]   # resident bf16 h
        acc_ref[...] += jnp.dot(a_ref[...], hk,                  # bf16 x bf16 MXU
                                preferred_element_type=jnp.float32)

    @pl.when(k == pl.num_programs(1) - 1)
    def _():
        hi = h_ref[pl.ds(pl.multiple_of(i * tm, tm), tm), :].astype(jnp.float32)
        agg = acc_ref[...] + hi                                   # self loop
        out = jnp.dot(agg.astype(jnp.bfloat16), w_ref[...],      # bf16 MXU epilogue
                      preferred_element_type=jnp.float32)
        out = jnp.maximum(out + b_ref[...], 0.0)                  # dropout(id)+relu
        x_new = out + hi                                          # residual on normed h
        # Emit the *next* layer's LayerNorm directly (also the decoder input).
        o_ref[...] = _layernorm(x_new, g_ref[...], be_ref[...],
                                d_valid).astype(o_ref.dtype)


def _decoder_kernel(h_ref, w_ref, b_ref, o_ref):
    # input is already LayerNorm'ed by the last GNN layer kernel
    o_ref[...] = (
        jnp.dot(h_ref[...], w_ref[...], preferred_element_type=jnp.float32)
        + b_ref[...]
    )


# ------------------------------ forward glue --------------------------------

@functools.partial(jax.jit, static_argnames=("tm", "tk", "max_nnz"))
def _ampgnn_forward_jit(x, adj, kblk, nblk, params, *, tm, tk, max_nnz):
    n, in_dim = x.shape
    n_p = adj.shape[0]
    env_dim = params["w_enc"].shape[1]
    out_dim = params["w_dec"].shape[1]
    num_layers = params["w_layer"].shape[0]

    in_p = _round_up(in_dim, 128)
    env_p = _round_up(env_dim, 128)
    out_p = _round_up(out_dim, 128)
    grid_rows = n_p // tm

    def pad2(a, r, c, dt):
        a = a.astype(dt)
        return jnp.pad(a, ((0, r - a.shape[0]), (0, c - a.shape[1])))

    x_p = pad2(x, n_p, in_p, jnp.bfloat16)
    w_enc = pad2(params["w_enc"], in_p, env_p, jnp.bfloat16)
    b_enc = pad2(params["b_enc"], 1, env_p, jnp.float32)
    w_dec = pad2(params["w_dec"], env_p, out_p, jnp.bfloat16)
    b_dec = pad2(params["b_dec"], 1, out_p, jnp.float32)
    gamma = pad2(params["ln_gamma"], 1, env_p, jnp.float32)
    beta = pad2(params["ln_beta"], 1, env_p, jnp.float32)
    w_lay = jnp.pad(params["w_layer"].astype(jnp.bfloat16),
                    ((0, 0), (0, env_p - env_dim), (0, env_p - env_dim)))
    b_lay = jnp.pad(params["b_layer"].astype(jnp.float32),
                    ((0, 0), (0, 0), (0, env_p - env_dim)))

    vmem = _vmem_limit_bytes(n_p, env_p, tm, tk)
    cp_rows = pltpu.CompilerParams(dimension_semantics=("parallel",),
                                   vmem_limit_bytes=vmem)
    cp_layer = pltpu.CompilerParams(dimension_semantics=("parallel", "arbitrary"),
                                    vmem_limit_bytes=vmem)

    # ---- encoder + relu + shared LayerNorm (bf16 activation out) ------------
    h = pl.pallas_call(
        functools.partial(_encoder_kernel, d_valid=env_dim),
        out_shape=jax.ShapeDtypeStruct((n_p, env_p), jnp.bfloat16),
        grid=(grid_rows,),
        in_specs=[
            pl.BlockSpec((tm, in_p), lambda i: (i, 0)),
            pl.BlockSpec((in_p, env_p), lambda i: (0, 0)),
            pl.BlockSpec((1, env_p), lambda i: (0, 0)),
            pl.BlockSpec((1, env_p), lambda i: (0, 0)),
            pl.BlockSpec((1, env_p), lambda i: (0, 0)),
        ],
        out_specs=pl.BlockSpec((tm, env_p), lambda i: (i, 0)),
        compiler_params=cp_rows,
    )(x_p, w_enc, b_enc, gamma, beta)

    # ---- stacked GNN layers: block-sparse A @ h + fused conv/relu/res/LN ----
    layer_fn = pl.pallas_call(
        functools.partial(_gnn_layer_kernel, d_valid=env_dim, tm=tm, tk=tk,
                          max_nnz=max_nnz),
        out_shape=jax.ShapeDtypeStruct((n_p, env_p), jnp.bfloat16),
        grid_spec=pltpu.PrefetchScalarGridSpec(
            num_scalar_prefetch=2,
            grid=(grid_rows, max_nnz),
            in_specs=[
                # A tile (bf16): column block follows the prefetched block-CSR ids
                pl.BlockSpec((tm, tk),
                             lambda i, k, kb, nb: (i, kb[i * max_nnz + k])),
                # h resident in VMEM for the whole layer (bf16)
                pl.BlockSpec((n_p, env_p), lambda i, k, kb, nb: (0, 0)),
                pl.BlockSpec((env_p, env_p), lambda i, k, kb, nb: (0, 0)),  # W (bf16)
                pl.BlockSpec((1, env_p), lambda i, k, kb, nb: (0, 0)),      # b
                pl.BlockSpec((1, env_p), lambda i, k, kb, nb: (0, 0)),      # gamma
                pl.BlockSpec((1, env_p), lambda i, k, kb, nb: (0, 0)),      # beta
            ],
            out_specs=pl.BlockSpec((tm, env_p), lambda i, k, kb, nb: (i, 0)),
            scratch_shapes=[pltpu.VMEM((tm, env_p), jnp.float32)]),
        compiler_params=cp_layer,
    )
    for l in range(num_layers):
        h = layer_fn(kblk, nblk, adj, h, w_lay[l], b_lay[l], gamma, beta)

    # ---- decoder (final LayerNorm already applied by last layer kernel) -----
    out = pl.pallas_call(
        _decoder_kernel,
        out_shape=jax.ShapeDtypeStruct((n_p, out_p), jnp.float32),
        grid=(grid_rows,),
        in_specs=[
            pl.BlockSpec((tm, env_p), lambda i: (i, 0)),
            pl.BlockSpec((env_p, out_p), lambda i: (0, 0)),
            pl.BlockSpec((1, out_p), lambda i: (0, 0)),
        ],
        out_specs=pl.BlockSpec((tm, out_p), lambda i: (i, 0)),
        compiler_params=cp_rows,
    )(h, w_dec, b_dec)

    # result = 0 + x ; slice away the node / lane padding
    return out[:n, :out_dim]


def ampgnn_forward(x, edge_index, params):
    """use_model=False forward. The graph is assumed static across calls, so
    the adjacency and the block-sparsity metadata are built once here (host
    side) and all heavy compute runs in jitted Pallas kernels."""
    n = x.shape[0]
    n_p = _round_up(max(n, 8), 128)
    tk = _pick_tile(n_p, 1024)          # A-streaming / contraction granularity
    tm = _pick_tile(n_p, 512)           # row blocks (megacore-sharded axis)
    while tm > 128 and n_p // tm < 2:   # keep >= 2 row blocks for v7x megacore
        tm //= 2
    grid_rows = n_p // tm
    grid_kblks = n_p // tk

    # Dense adjacency built directly in its streamed dtype (bf16).
    # use_model=False  =>  in_prob/out_prob all-ones  =>  edge_weight == 1.
    e = edge_index.shape[1]
    u, v = edge_index[0], edge_index[1]
    adj = jnp.zeros((n_p, n_p), jnp.bfloat16).at[v, u].add(
        jnp.ones((e,), jnp.bfloat16))
    # TODO(synk): bf16 adjacency is exact only while summed duplicate-edge
    # weights are small integers; revisit for the use_model=True fractional
    # edge-weight path (and fp8-A on v7x).

    # Block-CSR over (tm x tk) tiles of A: per row block, the nonzero k-block
    # ids, padded with the last valid id (pipeline then skips the re-DMA).
    ei = np.asarray(edge_index)
    occ = np.zeros((grid_rows, grid_kblks), dtype=bool)
    occ[ei[1] // tm, ei[0] // tk] = True
    nblk = occ.sum(axis=1).astype(np.int32)
    max_nnz = max(int(nblk.max()), 1)
    kblk = np.zeros((grid_rows, max_nnz), dtype=np.int32)
    for i in range(grid_rows):
        ids = np.flatnonzero(occ[i])
        kblk[i, :ids.size] = ids
        if 0 < ids.size < max_nnz:
            kblk[i, ids.size:] = ids[-1]

    return _ampgnn_forward_jit(x, adj, jnp.asarray(kblk.reshape(-1)),
                               jnp.asarray(nblk), params,
                               tm=tm, tk=tk, max_nnz=max_nnz)


def init_params(key, in_dim, env_dim, out_dim, num_layers):
    ks = jax.random.split(key, 2 + num_layers)
    return {
        "w_enc": jax.random.normal(ks[0], (in_dim, env_dim), jnp.float32) * 0.1,
        "b_enc": jnp.zeros((1, env_dim), jnp.float32),
        "w_layer": jnp.stack([
            jax.random.normal(ks[2 + l], (env_dim, env_dim), jnp.float32) * 0.1
            for l in range(num_layers)
        ]),
        "b_layer": jnp.zeros((num_layers, 1, env_dim), jnp.float32),
        "w_dec": jax.random.normal(ks[1], (env_dim, out_dim), jnp.float32) * 0.1,
        "b_dec": jnp.zeros((1, out_dim), jnp.float32),
        # NOTE: the PyTorch module uses ONE shared nn.LayerNorm for every layer
        # and the pre-decoder norm, so a single gamma/beta pair is correct.
        "ln_gamma": jnp.ones((1, env_dim), jnp.float32),
        "ln_beta": jnp.zeros((1, env_dim), jnp.float32),
    }


if __name__ == "__main__":
    # small synthetic graph
    N, E = 64, 128
    IN_DIM, ENV_DIM, OUT_DIM, NUM_LAYERS = 16, 32, 8, 3

    key = jax.random.PRNGKey(0)
    kx, ke, kp = jax.random.split(key, 3)

    x = jax.random.normal(kx, (N, IN_DIM), jnp.float32)
    edge_index = jax.random.randint(ke, (2, E), 0, N, dtype=jnp.int32)

    params = init_params(kp, IN_DIM, ENV_DIM, OUT_DIM, NUM_LAYERS)

    out = ampgnn_forward(x, edge_index, params)
    jax.block_until_ready(out)

    assert out.shape == (N, OUT_DIM), out.shape
    assert out.dtype == jnp.float32
    assert bool(jnp.all(jnp.isfinite(out)))
    print("KERNEL_OK")
</pallas_src>

<mosaic_0001>
module attributes {stable_mosaic.version = 11 : i64} {
  func.func @_encoder_kernel(%arg0: i32, %arg1: memref<128x128xbf16, #tpu.memory_space<vmem>>, %arg2: memref<128x128xbf16, #tpu.memory_space<vmem>>, %arg3: memref<1x128xf32, #tpu.memory_space<vmem>>, %arg4: memref<1x128xf32, #tpu.memory_space<vmem>>, %arg5: memref<1x128xf32, #tpu.memory_space<vmem>>, %arg6: memref<128x128xbf16, #tpu.memory_space<vmem>>) attributes {dimension_semantics = [#tpu.dimension_semantics<parallel>], iteration_bounds = array<i64: 1>, scalar_prefetch = 0 : i64, scratch_operands = 0 : i64, tpu.core_type = #tpu.core_type<tc>, window_params = [{transform_indices = @transform_0, window_bounds = array<i64: 128, 128>}, {pipeline_mode = #tpu.pipeline_mode<synchronous>, transform_indices = @transform_1, window_bounds = array<i64: 128, 128>}, {pipeline_mode = #tpu.pipeline_mode<synchronous>, transform_indices = @transform_2, window_bounds = array<i64: 1, 128>}, {pipeline_mode = #tpu.pipeline_mode<synchronous>, transform_indices = @transform_3, window_bounds = array<i64: 1, 128>}, {pipeline_mode = #tpu.pipeline_mode<synchronous>, transform_indices = @transform_4, window_bounds = array<i64: 1, 128>}, {transform_indices = @transform_5, window_bounds = array<i64: 128, 128>}]} {
    %c0 = arith.constant 0 : index
    %c0_0 = arith.constant 0 : index
    %0 = vector.load %arg1[%c0, %c0_0] : memref<128x128xbf16, #tpu.memory_space<vmem>>, vector<128x128xbf16>
    %c0_1 = arith.constant 0 : index
    %c0_2 = arith.constant 0 : index
    %1 = vector.load %arg2[%c0_1, %c0_2] : memref<128x128xbf16, #tpu.memory_space<vmem>>, vector<128x128xbf16>
    %cst = arith.constant dense<0.000000e+00> : vector<128x128xf32>
    %2 = tpu.matmul %0, %1, %cst {dimension_numbers = #tpu.dot_dimension_numbers<[1], [0], [0], [1], [0, 0, 1, 1], [], []>} : vector<128x128xbf16>, vector<128x128xbf16>, vector<128x128xf32> -> vector<128x128xf32>
    %c0_3 = arith.constant 0 : index
    %c0_4 = arith.constant 0 : index
    %3 = vector.load %arg3[%c0_3, %c0_4] : memref<1x128xf32, #tpu.memory_space<vmem>>, vector<1x128xf32>
    %4 = vector.broadcast %3 : vector<1x128xf32> to vector<128x128xf32>
    %5 = arith.addf %2, %4 : vector<128x128xf32>
    %cst_5 = arith.constant 0.000000e+00 : f32
    %6 = vector.broadcast %cst_5 : f32 to vector<128x128xf32>
    %7 = arith.maximumf %5, %6 : vector<128x128xf32>
    %c0_6 = arith.constant 0 : index
    %c0_7 = arith.constant 0 : index
    %8 = vector.load %arg4[%c0_6, %c0_7] : memref<1x128xf32, #tpu.memory_space<vmem>>, vector<1x128xf32>
    %c0_8 = arith.constant 0 : index
    %c0_9 = arith.constant 0 : index
    %9 = vector.load %arg5[%c0_8, %c0_9] : memref<1x128xf32, #tpu.memory_space<vmem>>, vector<1x128xf32>
    %10 = tpu.iota {dimensions = array<i32: 1>} : vector<128x128xi32>
    %c32_i32 = arith.constant 32 : i32
    %11 = vector.broadcast %c32_i32 : i32 to vector<128x128xi32>
    %12 = arith.cmpi slt, %10, %11 : vector<128x128xi32>
    %cst_10 = arith.constant dense<0.000000e+00> : vector<128xf32>
    %13 = vector.multi_reduction <add>, %7, %cst_10 [1] : vector<128x128xf32> to vector<128xf32>
    %14 = vector.shape_cast %13 : vector<128xf32> to vector<128x1xf32>
    %cst_11 = arith.constant 3.125000e-02 : f32
    %15 = vector.broadcast %cst_11 : f32 to vector<128x1xf32>
    %16 = arith.mulf %14, %15 : vector<128x1xf32>
    %17 = vector.broadcast %16 : vector<128x1xf32> to vector<128x128xf32>
    %18 = arith.subf %7, %17 : vector<128x128xf32>
    %cst_12 = arith.constant 0.000000e+00 : f32
    %19 = vector.broadcast %cst_12 : f32 to vector<128x128xf32>
    %20 = arith.select %12, %18, %19 : vector<128x128xi1>, vector<128x128xf32>
    %21 = arith.mulf %20, %20 : vector<128x128xf32>
    %cst_13 = arith.constant dense<0.000000e+00> : vector<128xf32>
    %22 = vector.multi_reduction <add>, %21, %cst_13 [1] : vector<128x128xf32> to vector<128xf32>
    %23 = vector.shape_cast %22 : vector<128xf32> to vector<128x1xf32>
    %cst_14 = arith.constant 3.125000e-02 : f32
    %24 = vector.broadcast %cst_14 : f32 to vector<128x1xf32>
    %25 = arith.mulf %23, %24 : vector<128x1xf32>
    %cst_15 = arith.constant 9.99999974E-6 : f32
    %26 = vector.broadcast %cst_15 : f32 to vector<128x1xf32>
    %27 = arith.addf %25, %26 : vector<128x1xf32>
    %28 = math.rsqrt %27 : vector<128x1xf32>
    %29 = vector.broadcast %28 : vector<128x1xf32> to vector<128x128xf32>
    %30 = arith.mulf %20, %29 : vector<128x128xf32>
    %31 = vector.broadcast %8 : vector<1x128xf32> to vector<128x128xf32>
    %32 = arith.mulf %30, %31 : vector<128x128xf32>
    %33 = vector.broadcast %9 : vector<1x128xf32> to vector<128x128xf32>
    %34 = arith.addf %32, %33 : vector<128x128xf32>
    %35 = arith.truncf %34 : vector<128x128xf32> to vector<128x128xbf16>
    %c0_16 = arith.constant 0 : index
    %c0_17 = arith.constant 0 : index
    %36 = vector.load %arg6[%c0_16, %c0_17] : memref<128x128xbf16, #tpu.memory_space<vmem>>, vector<128x128xbf16>
    tpu.vector_store %arg6[%c0_16, %c0_17], %35 {strides = array<i32>} : memref<128x128xbf16, #tpu.memory_space<vmem>>, vector<128x128xbf16>,
    return
  }
  func.func @transform_0(%arg0: i32) -> (i32, i32) {
    %c0_i32 = arith.constant 0 : i32
    %c0_i32_0 = arith.constant 0 : i32
    return %arg0, %c0_i32 : i32, i32
  }
  func.func @transform_1(%arg0: i32) -> (i32, i32) {
    %c0_i32 = arith.constant 0 : i32
    %c0_i32_0 = arith.constant 0 : i32
    %c0_i32_1 = arith.constant 0 : i32
    return %c0_i32, %c0_i32_0 : i32, i32
  }
  func.func @transform_2(%arg0: i32) -> (i32, i32) {
    %c0_i32 = arith.constant 0 : i32
    %c0_i32_0 = arith.constant 0 : i32
    %c0_i32_1 = arith.constant 0 : i32
    return %c0_i32, %c0_i32_0 : i32, i32
  }
  func.func @transform_3(%arg0: i32) -> (i32, i32) {
    %c0_i32 = arith.constant 0 : i32
    %c0_i32_0 = arith.constant 0 : i32
    %c0_i32_1 = arith.constant 0 : i32
    return %c0_i32, %c0_i32_0 : i32, i32
  }
  func.func @transform_4(%arg0: i32) -> (i32, i32) {
    %c0_i32 = arith.constant 0 : i32
    %c0_i32_0 = arith.constant 0 : i32
    %c0_i32_1 = arith.constant 0 : i32
    return %c0_i32, %c0_i32_0 : i32, i32
  }
  func.func @transform_5(%arg0: i32) -> (i32, i32) {
    %c0_i32 = arith.constant 0 : i32
    %c0_i32_0 = arith.constant 0 : i32
    return %arg0, %c0_i32 : i32, i32
  }
}

module attributes {stable_mosaic.version = 11 : i64} {
  func.func @_gnn_layer_kernel(%arg0: i32, %arg1: i32, %arg2: memref<1xi32, #tpu.memory_space<smem>>, %arg3: memref<1xi32, #tpu.memory_space<smem>>, %arg4: memref<128x128xbf16, #tpu.memory_space<vmem>>, %arg5: memref<128x128xbf16, #tpu.memory_space<vmem>>, %arg6: memref<128x128xbf16, #tpu.memory_space<vmem>>, %arg7: memref<1x128xf32, #tpu.memory_space<vmem>>, %arg8: memref<1x128xf32, #tpu.memory_space<vmem>>, %arg9: memref<1x128xf32, #tpu.memory_space<vmem>>, %arg10: memref<128x128xbf16, #tpu.memory_space<vmem>>, %arg11: memref<128x128xf32, #tpu.memory_space<vmem>>) attributes {dimension_semantics = [#tpu.dimension_semantics<parallel>, #tpu.dimension_semantics<arbitrary>], iteration_bounds = array<i64: 1, 1>, scalar_prefetch = 2 : i64, scratch_operands = 1 : i64, tpu.core_type = #tpu.core_type<tc>, window_params = [{transform_indices = @transform_0, window_bounds = array<i64: 128, 128>}, {pipeline_mode = #tpu.pipeline_mode<synchronous>, transform_indices = @transform_1, window_bounds = array<i64: 128, 128>}, {pipeline_mode = #tpu.pipeline_mode<synchronous>, transform_indices = @transform_2, window_bounds = array<i64: 128, 128>}, {pipeline_mode = #tpu.pipeline_mode<synchronous>, transform_indices = @transform_3, window_bounds = array<i64: 1, 128>}, {pipeline_mode = #tpu.pipeline_mode<synchronous>, transform_indices = @transform_4, window_bounds = array<i64: 1, 128>}, {pipeline_mode = #tpu.pipeline_mode<synchronous>, transform_indices = @transform_5, window_bounds = array<i64: 1, 128>}, {transform_indices = @transform_6, window_bounds = array<i64: 128, 128>}]} {
    %c0_i32 = arith.constant 0 : i32
    %0 = arith.cmpi eq, %arg1, %c0_i32 : i32
    %1 = arith.extui %0 : i1 to i32
    %c0_i32_0 = arith.constant 0 : i32
    %2 = arith.cmpi ne, %1, %c0_i32_0 : i32
    scf.if %2 {
      %cst = arith.constant 0.000000e+00 : f32
      %11 = vector.broadcast %cst : f32 to vector<128x128xf32>
      %c0 = arith.constant 0 : index
      %c0_4 = arith.constant 0 : index
      %12 = vector.load %arg11[%c0, %c0_4] : memref<128x128xf32, #tpu.memory_space<vmem>>, vector<128x128xf32>
      tpu.vector_store %arg11[%c0, %c0_4], %11 {strides = array<i32>} : memref<128x128xf32, #tpu.memory_space<vmem>>, vector<128x128xf32>,
    } else {
    }
    %3 = arith.index_cast %arg0 : i32 to index
    %4 = memref.load %arg3[%3] : memref<1xi32, #tpu.memory_space<smem>>
    %5 = arith.cmpi slt, %arg1, %4 : i32
    %6 = arith.extui %5 : i1 to i32
    %c0_i32_1 = arith.constant 0 : i32
    %7 = arith.cmpi ne, %6, %c0_i32_1 : i32
    scf.if %7 {
      %c1_i32 = arith.constant 1 : i32
      %11 = arith.muli %arg0, %c1_i32 : i32
      %12 = arith.addi %11, %arg1 : i32
      %13 = arith.index_cast %12 : i32 to index
      %14 = memref.load %arg2[%13] : memref<1xi32, #tpu.memory_space<smem>>
      %c128_i32 = arith.constant 128 : i32
      %15 = arith.muli %14, %c128_i32 : i32
      %16 = tpu.assume_multiple %15, 128 : i32
      %17 = arith.index_cast %16 : i32 to index
      %c0 = arith.constant 0 : index
      %18 = vector.load %arg5[%17, %c0] : memref<128x128xbf16, #tpu.memory_space<vmem>>, vector<128x128xbf16>
      %c0_4 = arith.constant 0 : index
      %c0_5 = arith.constant 0 : index
      %19 = vector.load %arg11[%c0_4, %c0_5] : memref<128x128xf32, #tpu.memory_space<vmem>>, vector<128x128xf32>
      %c0_6 = arith.constant 0 : index
      %c0_7 = arith.constant 0 : index
      %20 = vector.load %arg4[%c0_6, %c0_7] : memref<128x128xbf16, #tpu.memory_space<vmem>>, vector<128x128xbf16>
      %cst = arith.constant dense<0.000000e+00> : vector<128x128xf32>
      %21 = tpu.matmul %20, %18, %cst {dimension_numbers = #tpu.dot_dimension_numbers<[1], [0], [0], [1], [0, 0, 1, 1], [], []>} : vector<128x128xbf16>, vector<128x128xbf16>, vector<128x128xf32> -> vector<128x128xf32>
      %22 = arith.addf %19, %21 : vector<128x128xf32>
      %c0_8 = arith.constant 0 : index
      %c0_9 = arith.constant 0 : index
      %23 = vector.load %arg11[%c0_8, %c0_9] : memref<128x128xf32, #tpu.memory_space<vmem>>, vector<128x128xf32>
      tpu.vector_store %arg11[%c0_8, %c0_9], %22 {strides = array<i32>} : memref<128x128xf32, #tpu.memory_space<vmem>>, vector<128x128xf32>,
    } else {
    }
    %c0_i32_2 = arith.constant 0 : i32
    %8 = arith.cmpi eq, %arg1, %c0_i32_2 : i32
    %9 = arith.extui %8 : i1 to i32
    %c0_i32_3 = arith.constant 0 : i32
    %10 = arith.cmpi ne, %9, %c0_i32_3 : i32
    scf.if %10 {
      %c128_i32 = arith.constant 128 : i32
      %11 = arith.muli %arg0, %c128_i32 : i32
      %12 = tpu.assume_multiple %11, 128 : i32
      %13 = arith.index_cast %12 : i32 to index
      %c0 = arith.constant 0 : index
      %14 = vector.load %arg5[%13, %c0] : memref<128x128xbf16, #tpu.memory_space<vmem>>, vector<128x128xbf16>
      %15 = arith.extf %14 : vector<128x128xbf16> to vector<128x128xf32>
      %c0_4 = arith.constant 0 : index
      %c0_5 = arith.constant 0 : index
      %16 = vector.load %arg11[%c0_4, %c0_5] : memref<128x128xf32, #tpu.memory_space<vmem>>, vector<128x128xf32>
      %17 = arith.addf %16, %15 : vector<128x128xf32>
      %18 = arith.truncf %17 : vector<128x128xf32> to vector<128x128xbf16>
      %c0_6 = arith.constant 0 : index
      %c0_7 = arith.constant 0 : index
      %19 = vector.load %arg6[%c0_6, %c0_7] : memref<128x128xbf16, #tpu.memory_space<vmem>>, vector<128x128xbf16>
      %cst = arith.constant dense<0.000000e+00> : vector<128x128xf32>
      %20 = tpu.matmul %18, %19, %cst {dimension_numbers = #tpu.dot_dimension_numbers<[1], [0], [0], [1], [0, 0, 1, 1], [], []>} : vector<128x128xbf16>, vector<128x128xbf16>, vector<128x128xf32> -> vector<128x128xf32>
      %c0_8 = arith.constant 0 : index
      %c0_9 = arith.constant 0 : index
      %21 = vector.load %arg7[%c0_8, %c0_9] : memref<1x128xf32, #tpu.memory_space<vmem>>, vector<1x128xf32>
      %22 = vector.broadcast %21 : vector<1x128xf32> to vector<128x128xf32>
      %23 = arith.addf %20, %22 : vector<128x128xf32>
      %cst_10 = arith.constant 0.000000e+00 : f32
      %24 = vector.broadcast %cst_10 : f32 to vector<128x128xf32>
      %25 = arith.maximumf %23, %24 : vector<128x128xf32>
      %26 = arith.addf %25, %15 : vector<128x128xf32>
      %c0_11 = arith.constant 0 : index
      %c0_12 = arith.constant 0 : index
      %27 = vector.load %arg8[%c0_11, %c0_12] : memref<1x128xf32, #tpu.memory_space<vmem>>, vector<1x128xf32>
      %c0_13 = arith.constant 0 : index
      %c0_14 = arith.constant 0 : index
      %28 = vector.load %arg9[%c0_13, %c0_14] : memref<1x128xf32, #tpu.memory_space<vmem>>, vector<1x128xf32>
      %29 = tpu.iota {dimensions = array<i32: 1>} : vector<128x128xi32>
      %c32_i32 = arith.constant 32 : i32
      %30 = vector.broadcast %c32_i32 : i32 to vector<128x128xi32>
      %31 = arith.cmpi slt, %29, %30 : vector<128x128xi32>
      %cst_15 = arith.constant dense<0.000000e+00> : vector<128xf32>
      %32 = vector.multi_reduction <add>, %26, %cst_15 [1] : vector<128x128xf32> to vector<128xf32>
      %33 = vector.shape_cast %32 : vector<128xf32> to vector<128x1xf32>
      %cst_16 = arith.constant 3.125000e-02 : f32
      %34 = vector.broadcast %cst_16 : f32 to vector<128x1xf32>
      %35 = arith.mulf %33, %34 : vector<128x1xf32>
      %36 = vector.broadcast %35 : vector<128x1xf32> to vector<128x128xf32>
      %37 = arith.subf %26, %36 : vector<128x128xf32>
      %cst_17 = arith.constant 0.000000e+00 : f32
      %38 = vector.broadcast %cst_17 : f32 to vector<128x128xf32>
      %39 = arith.select %31, %37, %38 : vector<128x128xi1>, vector<128x128xf32>
      %40 = arith.mulf %39, %39 : vector<128x128xf32>
      %cst_18 = arith.constant dense<0.000000e+00> : vector<128xf32>
      %41 = vector.multi_reduction <add>, %40, %cst_18 [1] : vector<128x128xf32> to vector<128xf32>
      %42 = vector.shape_cast %41 : vector<128xf32> to vector<128x1xf32>
      %cst_19 = arith.constant 3.125000e-02 : f32
      %43 = vector.broadcast %cst_19 : f32 to vector<128x1xf32>
      %44 = arith.mulf %42, %43 : vector<128x1xf32>
      %cst_20 = arith.constant 9.99999974E-6 : f32
      %45 = vector.broadcast %cst_20 : f32 to vector<128x1xf32>
      %46 = arith.addf %44, %45 : vector<128x1xf32>
      %47 = math.rsqrt %46 : vector<128x1xf32>
      %48 = vector.broadcast %47 : vector<128x1xf32> to vector<128x128xf32>
      %49 = arith.mulf %39, %48 : vector<128x128xf32>
      %50 = vector.broadcast %27 : vector<1x128xf32> to vector<128x128xf32>
      %51 = arith.mulf %49, %50 : vector<128x128xf32>
      %52 = vector.broadcast %28 : vector<1x128xf32> to vector<128x128xf32>
      %53 = arith.addf %51, %52 : vector<128x128xf32>
      %54 = arith.truncf %53 : vector<128x128xf32> to vector<128x128xbf16>
      %c0_21 = arith.constant 0 : index
      %c0_22 = arith.constant 0 : index
      %55 = vector.load %arg10[%c0_21, %c0_22] : memref<128x128xbf16, #tpu.memory_space<vmem>>, vector<128x128xbf16>
      tpu.vector_store %arg10[%c0_21, %c0_22], %54 {strides = array<i32>} : memref<128x128xbf16, #tpu.memory_space<vmem>>, vector<128x128xbf16>,
    } else {
    }
    return
  }
  func.func @transform_0(%arg0: i32, %arg1: i32, %arg2: memref<1xi32, #tpu.memory_space<smem>>, %arg3: memref<1xi32, #tpu.memory_space<smem>>) -> (i32, i32) {
    %c1_i32 = arith.constant 1 : i32
    %0 = arith.muli %arg0, %c1_i32 : i32
    %1 = arith.addi %0, %arg1 : i32
    %2 = arith.index_cast %1 : i32 to index
    %3 = memref.load %arg2[%2] : memref<1xi32, #tpu.memory_space<smem>>
    %c0_i32 = arith.constant 0 : i32
    return %arg0, %3 : i32, i32
  }
  func.func @transform_1(%arg0: i32, %arg1: i32, %arg2: memref<1xi32, #tpu.memory_space<smem>>, %arg3: memref<1xi32, #tpu.memory_space<smem>>) -> (i32, i32) {
    %c0_i32 = arith.constant 0 : i32
    %c0_i32_0 = arith.constant 0 : i32
    %c0_i32_1 = arith.constant 0 : i32
    return %c0_i32, %c0_i32_0 : i32, i32
  }
  func.func @transform_2(%arg0: i32, %arg1: i32, %arg2: memref<1xi32, #tpu.memory_space<smem>>, %arg3: memref<1xi32, #tpu.memory_space<smem>>) -> (i32, i32) {
    %c0_i32 = arith.constant 0 : i32
    %c0_i32_0 = arith.constant 0 : i32
    %c0_i32_1 = arith.constant 0 : i32
    return %c0_i32, %c0_i32_0 : i32, i32
  }
  func.func @transform_3(%arg0: i32, %arg1: i32, %arg2: memref<1xi32, #tpu.memory_space<smem>>, %arg3: memref<1xi32, #tpu.memory_space<smem>>) -> (i32, i32) {
    %c0_i32 = arith.constant 0 : i32
    %c0_i32_0 = arith.constant 0 : i32
    %c0_i32_1 = arith.constant 0 : i32
    return %c0_i32, %c0_i32_0 : i32, i32
  }
  func.func @transform_4(%arg0: i32, %arg1: i32, %arg2: memref<1xi32, #tpu.memory_space<smem>>, %arg3: memref<1xi32, #tpu.memory_space<smem>>) -> (i32, i32) {
    %c0_i32 = arith.constant 0 : i32
    %c0_i32_0 = arith.constant 0 : i32
    %c0_i32_1 = arith.constant 0 : i32
    return %c0_i32, %c0_i32_0 : i32, i32
  }
  func.func @transform_5(%arg0: i32, %arg1: i32, %arg2: memref<1xi32, #tpu.memory_space<smem>>, %arg3: memref<1xi32, #tpu.memory_space<smem>>) -> (i32, i32) {
    %c0_i32 = arith.constant 0 : i32
    %c0_i32_0 = arith.constant 0 : i32
    %c0_i32_1 = arith.constant 0 : i32
    return %c0_i32, %c0_i32_0 : i32, i32
  }
  func.func @transform_6(%arg0: i32, %arg1: i32, %arg2: memref<1xi32, #tpu.memory_space<smem>>, %arg3: memref<1xi32, #tpu.memory_space<smem>>) -> (i32, i32) {
    %c0_i32 = arith.constant 0 : i32
    %c0_i32_0 = arith.constant 0 : i32
    return %arg0, %c0_i32 : i32, i32
  }
}

module attributes {stable_mosaic.version = 11 : i64} {
  func.func @_decoder_kernel(%arg0: i32, %arg1: memref<128x128xbf16, #tpu.memory_space<vmem>>, %arg2: memref<128x128xbf16, #tpu.memory_space<vmem>>, %arg3: memref<1x128xf32, #tpu.memory_space<vmem>>, %arg4: memref<128x128xf32, #tpu.memory_space<vmem>>) attributes {dimension_semantics = [#tpu.dimension_semantics<parallel>], iteration_bounds = array<i64: 1>, scalar_prefetch = 0 : i64, scratch_operands = 0 : i64, tpu.core_type = #tpu.core_type<tc>, window_params = [{transform_indices = @transform_0, window_bounds = array<i64: 128, 128>}, {pipeline_mode = #tpu.pipeline_mode<synchronous>, transform_indices = @transform_1, window_bounds = array<i64: 128, 128>}, {pipeline_mode = #tpu.pipeline_mode<synchronous>, transform_indices = @transform_2, window_bounds = array<i64: 1, 128>}, {transform_indices = @transform_3, window_bounds = array<i64: 128, 128>}]} {
    %c0 = arith.constant 0 : index
    %c0_0 = arith.constant 0 : index
    %0 = vector.load %arg1[%c0, %c0_0] : memref<128x128xbf16, #tpu.memory_space<vmem>>, vector<128x128xbf16>
    %c0_1 = arith.constant 0 : index
    %c0_2 = arith.constant 0 : index
    %1 = vector.load %arg2[%c0_1, %c0_2] : memref<128x128xbf16, #tpu.memory_space<vmem>>, vector<128x128xbf16>
    %cst = arith.constant dense<0.000000e+00> : vector<128x128xf32>
    %2 = tpu.matmul %0, %1, %cst {dimension_numbers = #tpu.dot_dimension_numbers<[1], [0], [0], [1], [0, 0, 1, 1], [], []>} : vector<128x128xbf16>, vector<128x128xbf16>, vector<128x128xf32> -> vector<128x128xf32>
    %c0_3 = arith.constant 0 : index
    %c0_4 = arith.constant 0 : index
    %3 = vector.load %arg3[%c0_3, %c0_4] : memref<1x128xf32, #tpu.memory_space<vmem>>, vector<1x128xf32>
    %4 = vector.broadcast %3 : vector<1x128xf32> to vector<128x128xf32>
    %5 = arith.addf %2, %4 : vector<128x128xf32>
    %c0_5 = arith.constant 0 : index
    %c0_6 = arith.constant 0 : index
    %6 = vector.load %arg4[%c0_5, %c0_6] : memref<128x128xf32, #tpu.memory_space<vmem>>, vector<128x128xf32>
    tpu.vector_store %arg4[%c0_5, %c0_6], %5 {strides = array<i32>} : memref<128x128xf32, #tpu.memory_space<vmem>>, vector<128x128xf32>,
    return
  }
  func.func @transform_0(%arg0: i32) -> (i32, i32) {
    %c0_i32 = arith.constant 0 : i32
    %c0_i32_0 = arith.constant 0 : i32
    return %arg0, %c0_i32 : i32, i32
  }
  func.func @transform_1(%arg0: i32) -> (i32, i32) {
    %c0_i32 = arith.constant 0 : i32
    %c0_i32_0 = arith.constant 0 : i32
    %c0_i32_1 = arith.constant 0 : i32
    return %c0_i32, %c0_i32_0 : i32, i32
  }
  func.func @transform_2(%arg0: i32) -> (i32, i32) {
    %c0_i32 = arith.constant 0 : i32
    %c0_i32_0 = arith.constant 0 : i32
    %c0_i32_1 = arith.constant 0 : i32
    return %c0_i32, %c0_i32_0 : i32, i32
  }
  func.func @transform_3(%arg0: i32) -> (i32, i32) {
    %c0_i32 = arith.constant 0 : i32
    %c0_i32_0 = arith.constant 0 : i32
    return %arg0, %c0_i32 : i32, i32
  }
}

</mosaic_0001>

<bundles_post_ra>
// kernel: _ampgnn_forward_jit.9
= control target key start
LH: loop header
LB: loop body
LE: loop exit
PB: predicated region body
PF: predicated region fallthrough
CT: control target
= control target key end

     0   :  { %s439_s1 = inlined_call_operand.vmem [shape: bf16[128,128], index: 1, kind: input, shape index: {}]   ;;  %s440_s2 = inlined_call_operand.vmem [shape: f32[1,128], index: 2, kind: input, shape index: {}]   ;;  %s441_s0 = inlined_call_operand.vmem [shape: bf16[128,128], index: 0, kind: input, shape index: {}]   ;;  %s442_s3 = inlined_call_operand.vmem [shape: f32[128,128], index: 3, kind: output, shape index: {}]  }
   0x1   :  { %v294_v0 = vld [vmem:[%s439_s1 + $0x38] sm:$0xff]  ;;  %v293_v1 = vld [vmem:[%s439_s1 + $0x30] sm:$0xff]  ;;  %v292_v2 = vld [vmem:[%s439_s1 + $0x28] sm:$0xff] }
   0x2   :  { %146 = vmatpush.bf16.msra.mxu0 %v294_v0  ;;  %295 = vmatpush.bf16.msra.mxu1 %v294_v0  ;;  %v291_v3 = vld [vmem:[%s439_s1 + $0x20] sm:$0xff]  ;;  %v290_v4 = vld [vmem:[%s439_s1 + $0x18] sm:$0xff]  ;;  %v289_v5 = vld [vmem:[%s439_s1 + $0x10] sm:$0xff] }
   0x3   :  { %296 = vmatpush.bf16.msra.mxu2 %v294_v0  ;;  %297 = vmatpush.bf16.msra.mxu3 %v294_v0  ;;  %v288_v6 = vld [vmem:[%s439_s1 + $0x8] sm:$0xff]  ;;  %v287_v7 = vld [vmem:[%s439_s1] sm:$0xff]  ;;  %v281_v9 = vld [vmem:[%s441_s0 + $0x10] sm:$0xff] }
   0x4   :  { %v279_v8 = vld [vmem:[%s441_s0] sm:$0xff]  ;;  %v285_v11 = vld [vmem:[%s441_s0 + $0x30] sm:$0xff]  ;;  %v280_v12 = vld [vmem:[%s441_s0 + $0x8] sm:$0xff] }
   0x5   :  { %v283_v10 = vld [vmem:[%s441_s0 + $0x20] sm:$0xff]  ;;  %v282_v13 = vld [vmem:[%s441_s0 + $0x18] sm:$0xff]  ;;  %v284_v14 = vld [vmem:[%s441_s0 + $0x28] sm:$0xff] }
   0x6   :  { %147 = vmatpush.bf16.msra.mxu0 %v293_v1  ;;  %298 = vmatpush.bf16.msra.mxu1 %v293_v1  ;;  %v286_v15 = vld [vmem:[%s441_s0 + $0x38] sm:$0xff]  ;;  %v319_v16 = vld [vmem:[%s440_s2] ss:$0 sm:$0xff] }
   0x7   :  { %299 = vmatpush.bf16.msra.mxu2 %v293_v1  ;;  %300 = vmatpush.bf16.msra.mxu3 %v293_v1 }
   0xa   :  { %148 = vmatpush.bf16.msra.mxu0 %v292_v2  ;;  %301 = vmatpush.bf16.msra.mxu1 %v292_v2 }
   0xb   :  { %302 = vmatpush.bf16.msra.mxu2 %v292_v2  ;;  %303 = vmatpush.bf16.msra.mxu3 %v292_v2 }
   0xe   :  { %149 = vmatpush.bf16.msra.mxu0 %v291_v3  ;;  %304 = vmatpush.bf16.msra.mxu1 %v291_v3 }
   0xf   :  { %305 = vmatpush.bf16.msra.mxu2 %v291_v3  ;;  %306 = vmatpush.bf16.msra.mxu3 %v291_v3 }
  0x12   :  { %150 = vmatpush.bf16.msra.mxu0 %v290_v4  ;;  %307 = vmatpush.bf16.msra.mxu1 %v290_v4 }
  0x13   :  { %308 = vmatpush.bf16.msra.mxu2 %v290_v4  ;;  %309 = vmatpush.bf16.msra.mxu3 %v290_v4 }
  0x16   :  { %151 = vmatpush.bf16.msra.mxu0 %v289_v5  ;;  %310 = vmatpush.bf16.msra.mxu1 %v289_v5 }
  0x17   :  { %311 = vmatpush.bf16.msra.mxu2 %v289_v5  ;;  %312 = vmatpush.bf16.msra.mxu3 %v289_v5 }
  0x1a   :  { %152 = vmatpush.bf16.msra.mxu0 %v288_v6  ;;  %313 = vmatpush.bf16.msra.mxu1 %v288_v6 }
  0x1b   :  { %314 = vmatpush.bf16.msra.mxu2 %v288_v6  ;;  %315 = vmatpush.bf16.msra.mxu3 %v288_v6 }
  0x1e   :  { %153 = vmatpush.bf16.msra.mxu0 %v287_v7  ;;  %316 = vmatpush.bf16.msra.mxu1 %v287_v7 }
  0x1f   :  { %317 = vmatpush.bf16.msra.mxu2 %v287_v7  ;;  %318 = vmatpush.bf16.msra.mxu3 %v287_v7 }
  0x21   :  { %154 = vmatmul.bf16.vlgmr.msra.gmra.mxu0 %v279_v8  ;;  %164 = vmatmul.bf16.vlgmr.msra.gmra.mxu1 %v281_v9 }
  0x22   :  { %174 = vmatmul.bf16.vlgmr.msra.gmra.mxu2 %v283_v10  ;;  %184 = vmatmul.bf16.vlgmr.msra.gmra.mxu3 %v285_v11 }
  0x31   :  { %159 = vmatmul.bf16.gmra.mxu0 %v280_v12  ;;  %169 = vmatmul.bf16.gmra.mxu1 %v282_v13 }
  0x32   :  { %179 = vmatmul.bf16.gmra.mxu2 %v284_v14  ;;  %189 = vmatmul.bf16.gmra.mxu3 %v286_v15 }
  0x9e   :  { %v155_v17 = vpop.f32.mrf.mxu0  ;;  %v165_v18 = vpop.f32.mrf.mxu1 }
  0x9f   :  { %v156_v19 = vadd.f32 %v319_v16, %v155_v17  ;;  %v166_v20 = vadd.f32 %v319_v16, %v165_v18 }
  0xa1   :  { %195 = vst [vmem:[%s442_s3] sm:$0xff] %v156_v19 }
  0xa2   :  { %199 = vst [vmem:[%s442_s3 + $0x20] sm:$0xff] %v166_v20 }
  0xa5   :  { %v175_v21 = vpop.f32.mrf.mxu2  ;;  %v185_v22 = vpop.f32.mrf.mxu3 }
  0xa6   :  { %v176_v23 = vadd.f32 %v319_v16, %v175_v21  ;;  %v186_v24 = vadd.f32 %v319_v16, %v185_v22  ;;  %v157_v25 = vpop.f32.mrf.mxu0  ;;  %v167_v26 = vpop.f32.mrf.mxu1 }
  0xa7   :  { %v158_v27 = vadd.f32 %v319_v16, %v157_v25  ;;  %v168_v28 = vadd.f32 %v319_v16, %v167_v26 }
  0xa8   :  { %203 = vst [vmem:[%s442_s3 + $0x40] sm:$0xff] %v176_v23 }
  0xa9   :  { %207 = vst [vmem:[%s442_s3 + $0x60] sm:$0xff] %v186_v24 }
  0xaa   :  { %196 = vst [vmem:[%s442_s3 + $0x8] sm:$0xff] %v158_v27 }
  0xab   :  { %200 = vst [vmem:[%s442_s3 + $0x28] sm:$0xff] %v168_v28 }
  0xad   :  { %v177_v29 = vpop.f32.mrf.mxu2  ;;  %v187_v30 = vpop.f32.mrf.mxu3 }
  0xae   :  { %v178_v31 = vadd.f32 %v319_v16, %v177_v29  ;;  %v188_v32 = vadd.f32 %v319_v16, %v187_v30  ;;  %v160_v33 = vpop.f32.mrf.mxu0  ;;  %v170_v34 = vpop.f32.mrf.mxu1 }
  0xaf   :  { %v161_v35 = vadd.f32 %v319_v16, %v160_v33  ;;  %v171_v36 = vadd.f32 %v319_v16, %v170_v34 }
  0xb0   :  { %204 = vst [vmem:[%s442_s3 + $0x48] sm:$0xff] %v178_v31 }
  0xb1   :  { %208 = vst [vmem:[%s442_s3 + $0x68] sm:$0xff] %v188_v32 }
  0xb2   :  { %197 = vst [vmem:[%s442_s3 + $0x10] sm:$0xff] %v161_v35 }
  0xb3   :  { %201 = vst [vmem:[%s442_s3 + $0x30] sm:$0xff] %v171_v36 }
  0xb5   :  { %v180_v37 = vpop.f32.mrf.mxu2  ;;  %v190_v38 = vpop.f32.mrf.mxu3 }
  0xb6   :  { %v181_v39 = vadd.f32 %v319_v16, %v180_v37  ;;  %v191_v40 = vadd.f32 %v319_v16, %v190_v38  ;;  %v162_v41 = vpop.f32.mrf.mxu0  ;;  %v172_v42 = vpop.f32.mrf.mxu1 }
  0xb7   :  { %v163_v43 = vadd.f32 %v319_v16, %v162_v41  ;;  %v173_v44 = vadd.f32 %v319_v16, %v172_v42 }
  0xb8   :  { %205 = vst [vmem:[%s442_s3 + $0x50] sm:$0xff] %v181_v39 }
  0xb9   :  { %209 = vst [vmem:[%s442_s3 + $0x70] sm:$0xff] %v191_v40 }
  0xba   :  { %198 = vst [vmem:[%s442_s3 + $0x18] sm:$0xff] %v163_v43 }
  0xbb   :  { %202 = vst [vmem:[%s442_s3 + $0x38] sm:$0xff] %v173_v44 }
  0xbd   :  { %v182_v45 = vpop.f32.mrf.mxu2  ;;  %v192_v46 = vpop.f32.mrf.mxu3 }
  0xbe   :  { %v183_v47 = vadd.f32 %v319_v16, %v182_v45  ;;  %v193_v48 = vadd.f32 %v319_v16, %v192_v46 }
  0xc0   :  { %206 = vst [vmem:[%s442_s3 + $0x58] sm:$0xff] %v183_v47 }
  0xc1   :  { %210 = vst [vmem:[%s442_s3 + $0x78] sm:$0xff] %v193_v48 }

// kernel: _ampgnn_forward_jit.5
= control target key start
LH: loop header
LB: loop body
LE: loop exit
PB: predicated region body
PF: predicated region fallthrough
CT: control target
= control target key end

     0   :  { %s1393_s1 = inlined_call_operand.vmem [shape: bf16[128,128], index: 1, kind: input, shape index: {}]   ;;  %s1394_s2 = inlined_call_operand.vmem [shape: f32[1,128], index: 2, kind: input, shape index: {}]   ;;  %s1395_s0 = inlined_call_operand.vmem [shape: bf16[128,128], index: 0, kind: input, shape index: {}]   ;;  %s1396_s3 = inlined_call_operand.vmem [shape: f32[1,128], index: 3, kind: input, shape index: {}]   ;;  %s1397_s4 = inlined_call_operand.vmem [shape: f32[1,128], index: 4, kind: input, shape index: {}]   ;;  %s1398_s5 = inlined_call_operand.vmem [shape: bf16[128,128], index: 5, kind: output, shape index: {}]  }
   0x1   :  { %v711_v0 = vld [vmem:[%s1393_s1 + $0x38] sm:$0xff]  ;;  %v710_v1 = vld [vmem:[%s1393_s1 + $0x30] sm:$0xff]  ;;  %v709_v2 = vld [vmem:[%s1393_s1 + $0x28] sm:$0xff] }
   0x2   :  { %152 = vmatpush.bf16.msra.mxu0 %v711_v0  ;;  %759 = vmatpush.bf16.msra.mxu1 %v711_v0  ;;  %v708_v3 = vld [vmem:[%s1393_s1 + $0x20] sm:$0xff]  ;;  %v707_v4 = vld [vmem:[%s1393_s1 + $0x18] sm:$0xff]  ;;  %v706_v5 = vld [vmem:[%s1393_s1 + $0x10] sm:$0xff] }
   0x3   :  { %760 = vmatpush.bf16.msra.mxu2 %v711_v0  ;;  %761 = vmatpush.bf16.msra.mxu3 %v711_v0  ;;  %v705_v6 = vld [vmem:[%s1393_s1 + $0x8] sm:$0xff]  ;;  %v704_v7 = vld [vmem:[%s1393_s1] sm:$0xff]  ;;  %v698_v9 = vld [vmem:[%s1395_s0 + $0x10] sm:$0xff] }
   0x4   :  { %v696_v8 = vld [vmem:[%s1395_s0] sm:$0xff]  ;;  %v702_v11 = vld [vmem:[%s1395_s0 + $0x30] sm:$0xff]  ;;  %v697_v12 = vld [vmem:[%s1395_s0 + $0x8] sm:$0xff] }
   0x5   :  { %v700_v10 = vld [vmem:[%s1395_s0 + $0x20] sm:$0xff]  ;;  %v699_v13 = vld [vmem:[%s1395_s0 + $0x18] sm:$0xff]  ;;  %v701_v14 = vld [vmem:[%s1395_s0 + $0x28] sm:$0xff] }
   0x6   :  { %153 = vmatpush.bf16.msra.mxu0 %v710_v1  ;;  %762 = vmatpush.bf16.msra.mxu1 %v710_v1  ;;  %v703_v15 = vld [vmem:[%s1395_s0 + $0x38] sm:$0xff]  ;;  %v783_v16 = vld [vmem:[%s1394_s2] ss:$0 sm:$0xff] }
   0x7   :  { %763 = vmatpush.bf16.msra.mxu2 %v710_v1  ;;  %764 = vmatpush.bf16.msra.mxu3 %v710_v1  ;;  %v219_v1 = vlaneseq }
   0xa   :  { %154 = vmatpush.bf16.msra.mxu0 %v709_v2  ;;  %765 = vmatpush.bf16.msra.mxu1 %v709_v2 }
   0xb   :  { %766 = vmatpush.bf16.msra.mxu2 %v709_v2  ;;  %767 = vmatpush.bf16.msra.mxu3 %v709_v2  ;;  %v979_v2 = vand.u32 127, %v219_v1 }
   0xd   :  { %vm221_vm0 = vcmp.lt.s32.totalorder %v979_v2, 32 }
   0xe   :  { %155 = vmatpush.bf16.msra.mxu0 %v708_v3  ;;  %768 = vmatpush.bf16.msra.mxu1 %v708_v3 }
   0xf   :  { %769 = vmatpush.bf16.msra.mxu2 %v708_v3  ;;  %770 = vmatpush.bf16.msra.mxu3 %v708_v3 }
  0x12   :  { %156 = vmatpush.bf16.msra.mxu0 %v707_v4  ;;  %771 = vmatpush.bf16.msra.mxu1 %v707_v4 }
  0x13   :  { %772 = vmatpush.bf16.msra.mxu2 %v707_v4  ;;  %773 = vmatpush.bf16.msra.mxu3 %v707_v4 }
  0x16   :  { %157 = vmatpush.bf16.msra.mxu0 %v706_v5  ;;  %774 = vmatpush.bf16.msra.mxu1 %v706_v5 }
  0x17   :  { %775 = vmatpush.bf16.msra.mxu2 %v706_v5  ;;  %776 = vmatpush.bf16.msra.mxu3 %v706_v5 }
  0x1a   :  { %158 = vmatpush.bf16.msra.mxu0 %v705_v6  ;;  %777 = vmatpush.bf16.msra.mxu1 %v705_v6 }
  0x1b   :  { %778 = vmatpush.bf16.msra.mxu2 %v705_v6  ;;  %779 = vmatpush.bf16.msra.mxu3 %v705_v6 }
  0x1e   :  { %159 = vmatpush.bf16.msra.mxu0 %v704_v7  ;;  %780 = vmatpush.bf16.msra.mxu1 %v704_v7 }
  0x1f   :  { %781 = vmatpush.bf16.msra.mxu2 %v704_v7  ;;  %782 = vmatpush.bf16.msra.mxu3 %v704_v7 }
  0x21   :  { %160 = vmatmul.bf16.vlgmr.msra.gmra.mxu0 %v696_v8  ;;  %170 = vmatmul.bf16.vlgmr.msra.gmra.mxu1 %v698_v9 }
  0x22   :  { %180 = vmatmul.bf16.vlgmr.msra.gmra.mxu2 %v700_v10  ;;  %190 = vmatmul.bf16.vlgmr.msra.gmra.mxu3 %v702_v11 }
  0x31   :  { %165 = vmatmul.bf16.gmra.mxu0 %v697_v12  ;;  %175 = vmatmul.bf16.gmra.mxu1 %v699_v13 }
  0x32   :  { %185 = vmatmul.bf16.gmra.mxu2 %v701_v14  ;;  %195 = vmatmul.bf16.gmra.mxu3 %v703_v15 }
  0x9e   :  { %v161_v17 = vpop.f32.mrf.mxu0  ;;  %v171_v18 = vpop.f32.mrf.mxu1 }
  0x9f   :  { %v899_v19 = vadd.f32 %v783_v16, %v161_v17  ;;  %v901_v20 = vadd.f32 %v783_v16, %v171_v18 }
  0xa1   :  { %v201_v21 = vmax.f32 %v899_v19, 0.0  ;;  %v205_v22 = vmax.f32 %v901_v20, 0.0 }
  0xa3   :  { %230 = vadd.xlane.f32.xlu2 %v205_v22  ;;  %222 = vadd.xlane.f32.xlu0 %v201_v21 }
  0xa5   :  { %v181_v23 = vpop.f32.mrf.mxu2  ;;  %v191_v24 = vpop.f32.mrf.mxu3 }
  0xa6   :  { %v909_v25 = vadd.f32 %v783_v16, %v181_v23  ;;  %v911_v26 = vadd.f32 %v783_v16, %v191_v24  ;;  %v163_v27 = vpop.f32.mrf.mxu0  ;;  %v173_v30 = vpop.f32.mrf.mxu1 }
  0xa7   :  { %v919_v31 = vadd.f32 %v783_v16, %v163_v27  ;;  %v921_v32 = vadd.f32 %v783_v16, %v173_v30 }
  0xa8   :  { %v209_v28 = vmax.f32 %v909_v25, 0.0  ;;  %v213_v29 = vmax.f32 %v911_v26, 0.0 }
  0xa9   :  { %v202_v37 = vmax.f32 %v919_v31, 0.0  ;;  %v206_v38 = vmax.f32 %v921_v32, 0.0 }
  0xab   :  { %238 = vadd.xlane.f32.xlu2 %v209_v28  ;;  %246 = vadd.xlane.f32.xlu0 %v213_v29 }
  0xad   :  { %v183_v33 = vpop.f32.mrf.mxu2  ;;  %v193_v34 = vpop.f32.mrf.mxu3 }
  0xae   :  { %v923_v35 = vadd.f32 %v783_v16, %v193_v34  ;;  %v166_v39 = vpop.f32.mrf.mxu0  ;;  %v936_v41 = vadd.f32 %v783_v16, %v183_v33  ;;  %v176_v47 = vpop.f32.mrf.mxu1 }
  0xaf   :  { %v928_v40 = vadd.f32 %v783_v16, %v166_v39  ;;  %v946_v48 = vadd.f32 %v783_v16, %v176_v47 }
  0xb0   :  { %v214_v36 = vmax.f32 %v923_v35, 0.0  ;;  %v210_v45 = vmax.f32 %v936_v41, 0.0 }
  0xb1   :  { %v203_v43 = vmax.f32 %v928_v40, 0.0  ;;  %v207_v52 = vmax.f32 %v946_v48, 0.0 }
  0xb2   :  { %248 = vadd.xlane.f32.xlu1 %v214_v36 }
  0xb3   :  { %232 = vadd.xlane.f32.xlu2 %v206_v38  ;;  %224 = vadd.xlane.f32.xlu0 %v202_v37 }
  0xb5   :  { %v186_v42 = vpop.f32.mrf.mxu2  ;;  %v196_v44 = vpop.f32.mrf.mxu3 }
  0xb6   :  { %v940_v46 = vadd.f32 %v783_v16, %v186_v42  ;;  %v168_v55 = vpop.f32.mrf.mxu0  ;;  %v953_v56 = vadd.f32 %v783_v16, %v196_v44  ;;  %v178_v62 = vpop.f32.mrf.mxu1 }
  0xb7   :  { %v963_v58 = vadd.f32 %v783_v16, %v168_v55  ;;  %v974_v63 = vadd.f32 %v783_v16, %v178_v62 }
  0xb8   :  { %v211_v50 = vmax.f32 %v940_v46, 0.0  ;;  %v215_v59 = vmax.f32 %v953_v56, 0.0 }
  0xb9   :  { %v204_v61 = vmax.f32 %v963_v58, 0.0  ;;  %v208_v0 = vmax.f32 %v974_v63, 0.0 }
  0xba   :  { %226 = vadd.xlane.f32.xlu1 %v203_v43 }
  0xbb   :  { %240 = vadd.xlane.f32.xlu0 %v210_v45 }
  0xbd   :  { %v188_v49 = vpop.f32.mrf.mxu2  ;;  %v198_v54 = vpop.f32.mrf.mxu3 }
  0xbe   :  { %v949_v51 = vadd.f32 %v783_v16, %v188_v49  ;;  %v961_v57 = vadd.f32 %v783_v16, %v198_v54 }
  0xc0   :  { %v212_v53 = vmax.f32 %v949_v51, 0.0  ;;  %v216_v60 = vmax.f32 %v961_v57, 0.0 }
  0xc2   :  { %244 = vadd.xlane.f32.xlu2 %v212_v53  ;;  %242 = vadd.xlane.f32.xlu1 %v211_v50 }
  0xc3   :  { %234 = vadd.xlane.f32.xlu0 %v207_v52 }
  0xca   :  { %250 = vadd.xlane.f32.xlu2 %v215_v59  ;;  %228 = vadd.xlane.f32.xlu1 %v204_v61 }
  0xcb   :  { %252 = vadd.xlane.f32.xlu0 %v216_v60 }
  0xd2   :  { %236 = vadd.xlane.f32.xlu1 %v208_v0 }
 0x116   :  { %v231_v3 = vpop.xlane.xlu2 %230  ;;  %v223_v4 = vpop.xlane.xlu0 %222 }
 0x117   :  { %v258_v5 = vmul.f32 0.03125, %v231_v3  ;;  %v254_v6 = vmul.f32 0.03125, %v223_v4 }
 0x119   :  { %v274_v7 = vsub.f32 %v205_v22, %v258_v5  ;;  %v270_v8 = vsub.f32 %v201_v21, %v254_v6 }
 0x11b   :  { %v988_v9 = vsel %vm221_vm0, %v274_v7, 0.0  ;;  %v992_v10 = vsel %vm221_vm0, %v270_v8, 0.0 }
 0x11c   :  { %v306_v11 = vmul.f32 %v988_v9, %v988_v9  ;;  %v302_v12 = vmul.f32 %v992_v10, %v992_v10 }
 0x11e   :  { %326 = vadd.xlane.f32.xlu2 %v306_v11  ;;  %v239_v13 = vpop.xlane.xlu2 %238  ;;  %318 = vadd.xlane.f32.xlu1 %v302_v12  ;;  %v247_v14 = vpop.xlane.xlu0 %246 }
 0x11f   :  { %v262_v15 = vmul.f32 0.03125, %v239_v13  ;;  %v266_v16 = vmul.f32 0.03125, %v247_v14 }
 0x121   :  { %v278_v17 = vsub.f32 %v209_v28, %v262_v15  ;;  %v282_v18 = vsub.f32 %v213_v29, %v266_v16 }
 0x123   :  { %v1004_v19 = vsel %vm221_vm0, %v278_v17, 0.0  ;;  %v1008_v20 = vsel %vm221_vm0, %v282_v18, 0.0 }
 0x124   :  { %v310_v21 = vmul.f32 %v1004_v19, %v1004_v19  ;;  %v314_v22 = vmul.f32 %v1008_v20, %v1008_v20 }
 0x125   :  { %v249_v23 = vpop.xlane.xlu1 %248 }
 0x126   :  { %v233_v24 = vpop.xlane.xlu2 %232  ;;  %334 = vadd.xlane.f32.xlu0 %v310_v21  ;;  %342 = vadd.xlane.f32.xlu1 %v314_v22  ;;  %v225_v25 = vpop.xlane.xlu0 %224 }
 0x127   :  { %v259_v26 = vmul.f32 0.03125, %v233_v24  ;;  %v255_v27 = vmul.f32 0.03125, %v225_v25 }
 0x129   :  { %v275_v28 = vsub.f32 %v206_v38, %v259_v26  ;;  %v271_v29 = vsub.f32 %v202_v37, %v255_v27 }
 0x12b   :  { %v1020_v30 = vsel %vm221_vm0, %v275_v28, 0.0  ;;  %v1024_v33 = vsel %vm221_vm0, %v271_v29, 0.0 }
 0x12c   :  { %v307_v34 = vmul.f32 %v1020_v30, %v1020_v30  ;;  %v303_v39 = vmul.f32 %v1024_v33, %v1024_v33 }
 0x12d   :  { %v227_v42 = vpop.xlane.xlu1 %226 }
 0x12e   :  { %v256_v32 = vmul.f32 0.03125, %v227_v42  ;;  %328 = vadd.xlane.f32.xlu0 %v307_v34  ;;  %320 = vadd.xlane.f32.xlu2 %v303_v39  ;;  %v241_v31 = vpop.xlane.xlu0 %240 }
 0x12f   :  { %v263_v37 = vmul.f32 0.03125, %v241_v31 }
 0x130   :  { %v272_v38 = vsub.f32 %v203_v43, %v256_v32 }
 0x131   :  { %v279_v44 = vsub.f32 %v210_v45, %v263_v37 }
 0x132   :  { %v1036_v47 = vsel %vm221_vm0, %v272_v38, 0.0 }
 0x133   :  { %v1040_v49 = vsel %vm221_vm0, %v279_v44, 0.0  ;;  %v304_v54 = vmul.f32 %v1036_v47, %v1036_v47 }
 0x134   :  { %v311_v55 = vmul.f32 %v1040_v49, %v1040_v49 }
 0x135   :  { %v245_v62 = vpop.xlane.xlu2 %244  ;;  %v243_v40 = vpop.xlane.xlu1 %242 }
 0x136   :  { %v265_v43 = vmul.f32 0.03125, %v245_v62  ;;  %v264_v1 = vmul.f32 0.03125, %v243_v40  ;;  %322 = vadd.xlane.f32.xlu0 %v304_v54  ;;  %336 = vadd.xlane.f32.xlu1 %v311_v55  ;;  %v235_v41 = vpop.xlane.xlu0 %234 }
 0x137   :  { %v260_v45 = vmul.f32 0.03125, %v235_v41 }
 0x138   :  { %v281_v3 = vsub.f32 %v212_v53, %v265_v43  ;;  %v280_v4 = vsub.f32 %v211_v50, %v264_v1 }
 0x139   :  { %v276_v5 = vsub.f32 %v207_v52, %v260_v45 }
 0x13a   :  { %v1054_v6 = vsel %vm221_vm0, %v280_v4, 0.0  ;;  %v1058_v7 = vsel %vm221_vm0, %v281_v3, 0.0 }
 0x13b   :  { %v312_v8 = vmul.f32 %v1054_v6, %v1054_v6  ;;  %v1064_v51 = vsel %vm221_vm0, %v276_v5, 0.0  ;;  %v313_v46 = vmul.f32 %v1058_v7, %v1058_v7 }
 0x13c   :  { %v308_v48 = vmul.f32 %v1064_v51, %v1064_v51 }
 0x13d   :  { %v251_v50 = vpop.xlane.xlu2 %250  ;;  %v229_v52 = vpop.xlane.xlu1 %228  ;;  %338 = vadd.xlane.f32.xlu2 %v312_v8 }
 0x13e   :  { %v268_v53 = vmul.f32 0.03125, %v251_v50  ;;  %v257_v11 = vmul.f32 0.03125, %v229_v52  ;;  %340 = vadd.xlane.f32.xlu0 %v313_v46  ;;  %330 = vadd.xlane.f32.xlu1 %v308_v48  ;;  %v253_v12 = vpop.xlane.xlu0 %252 }
 0x13f   :  { %v269_v15 = vmul.f32 0.03125, %v253_v12 }
 0x140   :  { %v284_v13 = vsub.f32 %v215_v59, %v268_v53  ;;  %v273_v14 = vsub.f32 %v204_v61, %v257_v11  ;;  %v267_v61 = vmul.f32 0.03125, %v249_v23 }
 0x141   :  { %v285_v56 = vsub.f32 %v216_v60, %v269_v15 }
 0x142   :  { %v1076_v16 = vsel %vm221_vm0, %v284_v13, 0.0  ;;  %v1080_v17 = vsel %vm221_vm0, %v273_v14, 0.0  ;;  %v283_v60 = vsub.f32 %v214_v36, %v267_v61 }
 0x143   :  { %v316_v18 = vmul.f32 %v1076_v16, %v1076_v16  ;;  %v305_v21 = vmul.f32 %v1080_v17, %v1080_v17  ;;  %v1092_v24 = vsel %vm221_vm0, %v285_v56, 0.0 }
 0x144   :  { %v317_v23 = vmul.f32 %v1092_v24, %v1092_v24  ;;  %v1106_v63 = vsel %vm221_vm0, %v283_v60, 0.0 }
 0x145   :  { %v237_v58 = vpop.xlane.xlu1 %236 }
 0x146   :  { %v261_v59 = vmul.f32 0.03125, %v237_v58  ;;  %346 = vadd.xlane.f32.xlu0 %v316_v18  ;;  %324 = vadd.xlane.f32.xlu1 %v305_v21 }
 0x148   :  { %v277_v22 = vsub.f32 %v208_v0, %v261_v59  ;;  %v315_v0 = vmul.f32 %v1106_v63, %v1106_v63 }
 0x14a   :  { %v1096_v25 = vsel %vm221_vm0, %v277_v22, 0.0 }
 0x14b   :  { %v309_v57 = vmul.f32 %v1096_v25, %v1096_v25 }
 0x14d   :  { %332 = vadd.xlane.f32.xlu2 %v309_v57 }
 0x14e   :  { %348 = vadd.xlane.f32.xlu1 %v317_v23 }
 0x155   :  { %344 = vadd.xlane.f32.xlu2 %v315_v0 }
 0x191   :  { %v327_v26 = vpop.xlane.xlu2 %326  ;;  %v319_v27 = vpop.xlane.xlu1 %318 }
 0x192   :  { %v354_v28 = vmul.f32 0.03125, %v327_v26  ;;  %v350_v29 = vmul.f32 0.03125, %v319_v27 }
 0x194   :  { %v370_v34 = vadd.f32 1e-05, %v354_v28  ;;  %v366_v35 = vadd.f32 1e-05, %v350_v29 }
 0x196   :  { %786 = vrsqrt.f32 %v370_v34  ;;  %vm428_vm2 = vweird.f32 %v370_v34  ;;  %vm388_vm5 = vweird.f32 %v366_v35 }
 0x197   :  { %788 = vrsqrt.f32 %v366_v35 }
 0x199   :  { %v335_v36 = vpop.xlane.xlu0 %334  ;;  %v343_v44 = vpop.xlane.xlu1 %342 }
 0x19a   :  { %v358_v39 = vmul.f32 0.03125, %v335_v36  ;;  %v362_v46 = vmul.f32 0.03125, %v343_v44 }
 0x19c   :  { %v1110_v42 = vpop.eup %786  ;;  %v1112_v32 = vadd.f32 1e-05, %v358_v39  ;;  %v1136_v18 = vadd.f32 1e-05, %v362_v46 }
 0x19d   :  { %v1114_v2 = vpop.eup %788  ;;  %v423_v31 = vmul.f32 %v1110_v42, %v370_v34  ;;  %vm429_vm1 = vweird.f32 %v1110_v42 }
 0x19e   :  { %v383_v37 = vmul.f32 %v1114_v2, %v366_v35  ;;  %790 = vrsqrt.f32 %v1112_v32  ;;  %vm389_vm3 = vweird.f32 %v1114_v2  ;;  %vm1148_vm4 = vmor %vm428_vm2, %vm429_vm1  ;;  %vm468_vm7 = vweird.f32 %v1112_v32 }
 0x19f   :  { %v424_v38 = vmul.f32 %v1110_v42, %v423_v31  ;;  %vm1160_vm6 = vmor %vm388_vm5, %vm389_vm3 }
 0x1a0   :  { %v384_v54 = vmul.f32 %v1114_v2, %v383_v37 }
 0x1a1   :  { %v321_v55 = vpop.xlane.xlu2 %320  ;;  %v329_v62 = vpop.xlane.xlu0 %328  ;;  %v425_v1 = vmul.f32 0.5, %v424_v38 }
 0x1a2   :  { %v351_v40 = vmul.f32 0.03125, %v321_v55  ;;  %v355_v43 = vmul.f32 0.03125, %v329_v62  ;;  %v385_v4 = vmul.f32 0.5, %v384_v54 }
 0x1a3   :  { %v426_v8 = vsub.f32 1.5, %v425_v1 }
 0x1a4   :  { %v1121_v41 = vadd.f32 1e-05, %v351_v40  ;;  %v1123_v45 = vadd.f32 1e-05, %v355_v43  ;;  %v1125_v3 = vpop.eup %790  ;;  %v386_v50 = vsub.f32 1.5, %v385_v4 }
 0x1a5   :  { %v463_v5 = vmul.f32 %v1125_v3, %v1112_v32  ;;  %v427_v13 = vmul.f32 %v1110_v42, %v426_v8  ;;  %vm469_vm8 = vweird.f32 %v1125_v3 }
 0x1a6   :  { %792 = vrsqrt.f32 %v1121_v41  ;;  %v387_v59 = vmul.f32 %v1114_v2, %v386_v50  ;;  %vm398_vm9 = vweird.f32 %v1121_v41  ;;  %vm1194_vm12 = vmor %vm468_vm7, %vm469_vm8  ;;  %vm438_vm13 = vweird.f32 %v1123_v45 }
 0x1a7   :  { %794 = vrsqrt.f32 %v1123_v45  ;;  %v464_v48 = vmul.f32 %v1125_v3, %v463_v5  ;;  %v431_v60 = vsel %vm1148_vm4, %v1110_v42, %v427_v13  ;;  %v1175_v42 = vld [vmem:[%s1396_s3] ss:$0 sm:$0xff] }
 0x1a8   :  { %v391_v29 = vsel %vm1160_vm6, %v1114_v2, %v387_v59  ;;  %v546_v31 = vmul.f32 %v431_v60, %v988_v9 }
 0x1a9   :  { %v337_v52 = vpop.xlane.xlu1 %336  ;;  %v323_v53 = vpop.xlane.xlu0 %322  ;;  %v465_v14 = vmul.f32 0.5, %v464_v48  ;;  %v542_v40 = vmul.f32 %v391_v29, %v992_v10 }
 0x1aa   :  { %v359_v11 = vmul.f32 0.03125, %v337_v52  ;;  %v352_v12 = vmul.f32 0.03125, %v323_v53  ;;  %v565_v48 = vmul.f32 %v1175_v42, %v546_v31 }
 0x1ab   :  { %v466_v23 = vsub.f32 1.5, %v465_v14 }
 0x1ac   :  { %v1134_v15 = vpop.eup %792  ;;  %v1138_v21 = vadd.f32 1e-05, %v359_v11  ;;  %v1140_v56 = vadd.f32 1e-05, %v352_v12  ;;  %v561_v11 = vmul.f32 %v1175_v42, %v542_v40 }
 0x1ad   :  { %v1142_v58 = vpop.eup %794  ;;  %v393_v61 = vmul.f32 %v1134_v15, %v1121_v41  ;;  %v467_v54 = vmul.f32 %v1125_v3, %v466_v23  ;;  %vm399_vm10 = vweird.f32 %v1134_v15 }
 0x1ae   :  { %v433_v57 = vmul.f32 %v1142_v58, %v1123_v45  ;;  %796 = vrsqrt.f32 %v1138_v21  ;;  %vm439_vm11 = vweird.f32 %v1142_v58  ;;  %vm400_vm14 = vmor %vm398_vm9, %vm399_vm10  ;;  %v1218_v45 = vld [vmem:[%s1397_s4] ss:$0 sm:$0xff]  ;;  %vm478_vm1 = vweird.f32 %v1138_v21 }
 0x1af   :  { %v394_v0 = vmul.f32 %v1134_v15, %v393_v61  ;;  %798 = vrsqrt.f32 %v1140_v56  ;;  %v471_v52 = vsel %vm1194_vm12, %v1125_v3, %v467_v54  ;;  %vm440_vm15 = vmor %vm438_vm13, %vm439_vm11  ;;  %vm408_vm8 = vweird.f32 %v1140_v56 }
 0x1b0   :  { %800 = vrsqrt.f32 %v1136_v18  ;;  %v434_v27 = vmul.f32 %v1142_v58, %v433_v57  ;;  %v339_v28 = vpop.xlane.xlu2 %338  ;;  %v550_v57 = vmul.f32 %v471_v52, %v1004_v19 }
 0x1b1   :  { %v395_v34 = vmul.f32 0.5, %v394_v0  ;;  %v360_v35 = vmul.f32 0.03125, %v339_v28  ;;  %v331_v36 = vpop.xlane.xlu1 %330  ;;  %v341_v39 = vpop.xlane.xlu0 %340 }
 0x1b2   :  { %v435_v37 = vmul.f32 0.5, %v434_v27  ;;  %v356_v38 = vmul.f32 0.03125, %v331_v36  ;;  %v361_v44 = vmul.f32 0.03125, %v341_v39  ;;  %v569_v31 = vmul.f32 %v1175_v42, %v550_v57 }
 0x1b3   :  { %v396_v55 = vsub.f32 1.5, %v395_v34  ;;  %v1180_v2 = vadd.f32 1e-05, %v360_v35 }
 0x1b4   :  { %v1182_v62 = vpop.eup %796  ;;  %v436_v43 = vsub.f32 1.5, %v435_v37  ;;  %v1186_v1 = vadd.f32 1e-05, %v356_v38  ;;  %v1202_v8 = vadd.f32 1e-05, %v361_v44 }
 0x1b5   :  { %v1188_v9 = vpop.eup %798  ;;  %v397_v5 = vmul.f32 %v1134_v15, %v396_v55  ;;  %v473_v10 = vmul.f32 %v1182_v62, %v1138_v21  ;;  %802 = vrsqrt.f32 %v1180_v2  ;;  %vm479_vm0 = vweird.f32 %v1182_v62 }
 0x1b6   :  { %v1204_v46 = vpop.eup %800  ;;  %v437_v32 = vmul.f32 %v1142_v58, %v436_v43  ;;  %v403_v50 = vmul.f32 %v1188_v9, %v1140_v56  ;;  %804 = vrsqrt.f32 %v1186_v1  ;;  %vm480_vm2 = vmor %vm478_vm1, %vm479_vm0  ;;  %vm409_vm3 = vweird.f32 %v1188_v9 }
 0x1b7   :  { %v401_v53 = vsel %vm400_vm14, %v1134_v15, %v397_v5  ;;  %v474_v41 = vmul.f32 %v1182_v62, %v473_v10  ;;  %v503_v3 = vmul.f32 %v1204_v46, %v1136_v18  ;;  %806 = vrsqrt.f32 %v1202_v8  ;;  %vm1287_vm9 = vmor %vm408_vm8, %vm409_vm3 }
 0x1b8   :  { %v543_v12 = vmul.f32 %v401_v53, %v1024_v33  ;;  %v441_v13 = vsel %vm440_vm15, %v1142_v58, %v437_v32  ;;  %v404_v14 = vmul.f32 %v1188_v9, %v403_v50  ;;  %v584_v58 = vadd.f32 %v1218_v45, %v565_v48 }
 0x1b9   :  { %v547_v15 = vmul.f32 %v441_v13, %v1020_v30  ;;  %v475_v59 = vmul.f32 0.5, %v474_v41  ;;  %v325_v61 = vpop.xlane.xlu1 %324  ;;  %v347_v22 = vpop.xlane.xlu0 %346  ;;  %v580_v30 = vadd.f32 %v1218_v45, %v561_v11  ;;  %v504_v48 = vmul.f32 %v1204_v46, %v503_v3 }
 0x1ba   :  { %v562_v60 = vmul.f32 %v1175_v42, %v543_v12  ;;  %v353_v23 = vmul.f32 0.03125, %v325_v61  ;;  %v364_v33 = vmul.f32 0.03125, %v347_v22  ;;  %v405_v29 = vmul.f32 0.5, %v404_v14 }
 0x1bb   :  { %v566_v0 = vmul.f32 %v1175_v42, %v547_v15  ;;  %v476_v26 = vsub.f32 1.5, %v475_v59  ;;  %v803_v27 = vpop.eup %802  ;;  %v588_v50 = vadd.f32 %v1218_v45, %v569_v31  ;;  %vm488_vm5 = vweird.f32 %v1180_v2 }
 0x1bc   :  { %v581_v28 = vadd.f32 %v1218_v45, %v562_v60  ;;  %v1243_v34 = vadd.f32 1e-05, %v353_v23  ;;  %v1245_v19 = vpop.eup %804  ;;  %v483_v39 = vmul.f32 %v803_v27, %v1180_v2  ;;  %v1254_v44 = vadd.f32 1e-05, %v364_v33 }
 0x1bd   :  { %v585_v35 = vadd.f32 %v1218_v45, %v566_v0  ;;  %v477_v36 = vmul.f32 %v1182_v62, %v476_v26  ;;  %v443_v38 = vmul.f32 %v1245_v19, %v1186_v1  ;;  %v807_v54 = vpop.eup %806  ;;  %v406_v4 = vsub.f32 1.5, %v405_v29 }
 0x1be   :  { %v715_v37 = vpack.c.bf16 %v581_v28, %v580_v30  ;;  %v484_v43 = vmul.f32 %v803_v27, %v483_v39  ;;  %808 = vrsqrt.f32 %v1243_v34  ;;  %v493_v5 = vmul.f32 %v807_v54, %v1202_v8 }
 0x1bf   :  { %v725_v55 = vpack.c.bf16 %v585_v35, %v584_v58  ;;  %v481_v40 = vsel %vm480_vm2, %v1182_v62, %v477_v36  ;;  %v444_v32 = vmul.f32 %v1245_v19, %v443_v38  ;;  %810 = vrsqrt.f32 %v1254_v44 }
 0x1c0   :  { %716 = vst [vmem:[%s1398_s5] sm:$0xff] %v715_v37   ;;  %v551_v21 = vmul.f32 %v481_v40, %v1040_v49  ;;  %v333_v10 = vpop.xlane.xlu2 %332  ;;  %v485_v62 = vmul.f32 0.5, %v484_v43  ;;  %v494_v53 = vmul.f32 %v807_v54, %v493_v5  ;;  %vm489_vm4 = vweird.f32 %v803_v27 }
 0x1c1   :  { %753 = vst [vmem:[%s1398_s5 + $0x10] sm:$0xff] %v725_v55   ;;  %v349_v49 = vpop.xlane.xlu1 %348  ;;  %v357_v11 = vmul.f32 0.03125, %v333_v10  ;;  %v407_v13 = vmul.f32 %v1188_v9, %v406_v4  ;;  %v445_v59 = vmul.f32 0.5, %v444_v32  ;;  %vm490_vm6 = vmor %vm488_vm5, %vm489_vm4  ;;  %vm499_vm7 = vweird.f32 %v807_v54 }
 0x1c2   :  { %v570_v52 = vmul.f32 %v1175_v42, %v551_v21  ;;  %v486_v41 = vsub.f32 1.5, %v485_v62  ;;  %v495_v14 = vmul.f32 0.5, %v494_v53  ;;  %v365_v22 = vmul.f32 0.03125, %v349_v49 }
 0x1c3   :  { %v1275_v61 = vadd.f32 1e-05, %v357_v11  ;;  %vm498_vm10 = vweird.f32 %v1202_v8  ;;  %v505_v30 = vmul.f32 0.5, %v504_v48  ;;  %v446_v28 = vsub.f32 1.5, %v445_v59 }
 0x1c4   :  { %v589_v12 = vadd.f32 %v1218_v45, %v570_v52  ;;  %v809_v3 = vpop.eup %808  ;;  %v487_v15 = vmul.f32 %v803_v27, %v486_v41  ;;  %v496_v60 = vsub.f32 1.5, %v495_v14  ;;  %vm500_vm11 = vmor %vm498_vm10, %vm499_vm7  ;;  %v1296_v35 = vadd.f32 1e-05, %v365_v22 }
 0x1c5   :  { %v413_v23 = vmul.f32 %v809_v3, %v1243_v34  ;;  %812 = vrsqrt.f32 %v1275_v61  ;;  %v1280_v58 = vpop.eup %810  ;;  %v411_v36 = vsel %vm1287_vm9, %v1188_v9, %v407_v13  ;;  %vm449_vm12 = vweird.f32 %v1245_v19 }
 0x1c6   :  { %v735_v57 = vpack.c.bf16 %v589_v12, %v588_v50  ;;  %v491_v33 = vsel %vm490_vm6, %v803_v27, %v487_v15  ;;  %v497_v26 = vmul.f32 %v807_v54, %v496_v60  ;;  %v523_v29 = vmul.f32 %v1280_v58, %v1254_v44 }
 0x1c7   :  { %v552_v0 = vmul.f32 %v491_v33, %v1054_v6  ;;  %v414_v56 = vmul.f32 %v809_v3, %v413_v23  ;;  %814 = vrsqrt.f32 %v1296_v35  ;;  %vm419_vm13 = vweird.f32 %v809_v3 }
 0x1c8   :  { %755 = vst [vmem:[%s1398_s5 + $0x20] sm:$0xff] %v735_v57   ;;  %v345_v27 = vpop.xlane.xlu2 %344  ;;  %v501_v39 = vsel %vm500_vm11, %v807_v54, %v497_v26  ;;  %v524_v38 = vmul.f32 %v1280_v58, %v523_v29  ;;  %v544_v9 = vmul.f32 %v411_v36, %v1036_v47  ;;  %v447_v54 = vmul.f32 %v1245_v19, %v446_v28 }
 0x1c9   :  { %v415_v6 = vmul.f32 0.5, %v414_v56  ;;  %v363_v31 = vmul.f32 0.03125, %v345_v27  ;;  %v571_v8 = vmul.f32 %v1175_v42, %v552_v0  ;;  %v553_v37 = vmul.f32 %v501_v39, %v1058_v7 }
 0x1ca   :  { %v525_v4 = vmul.f32 0.5, %v524_v38  ;;  %vm418_vm14 = vweird.f32 %v1243_v34  ;;  %vm448_vm15 = vweird.f32 %v1186_v1  ;;  %v506_v62 = vsub.f32 1.5, %v505_v30 }
 0x1cb   :  { %v416_v55 = vsub.f32 1.5, %v415_v6  ;;  %v1306_v40 = vadd.f32 1e-05, %v363_v31  ;;  %v813_v43 = vpop.eup %812  ;;  %v572_v21 = vmul.f32 %v1175_v42, %v553_v37  ;;  %v590_v10 = vadd.f32 %v1218_v45, %v571_v8  ;;  %vm420_vm0 = vmor %vm418_vm14, %vm419_vm13 }
 0x1cc   :  { %v453_v7 = vmul.f32 %v813_v43, %v1275_v61  ;;  %v526_v47 = vsub.f32 1.5, %v525_v4  ;;  %vm1319_vm1 = vmor %vm448_vm15, %vm449_vm12  ;;  %v563_v53 = vmul.f32 %v1175_v42, %v544_v9  ;;  %vm529_vm2 = vweird.f32 %v1280_v58 }
 0x1cd   :  { %v417_v5 = vmul.f32 %v809_v3, %v416_v55  ;;  %816 = vrsqrt.f32 %v1306_v40  ;;  %v591_v48 = vadd.f32 %v1218_v45, %v572_v21  ;;  %v815_v52 = vpop.eup %814  ;;  %v451_v1 = vsel %vm1319_vm1, %v1245_v19, %v447_v54 }
 0x1ce   :  { %v454_v50 = vmul.f32 %v813_v43, %v453_v7  ;;  %v527_v11 = vmul.f32 %v1280_v58, %v526_v47  ;;  %v533_v13 = vmul.f32 %v815_v52, %v1296_v35  ;;  %vm509_vm3 = vweird.f32 %v1204_v46 }
 0x1cf   :  { %v421_v34 = vsel %vm420_vm0, %v809_v3, %v417_v5  ;;  %v740_v49 = vpack.c.bf16 %v591_v48, %v590_v10  ;;  %vm528_vm4 = vweird.f32 %v1254_v44  ;;  %vm459_vm5 = vweird.f32 %v813_v43 }
 0x1d0   :  { %v545_v41 = vmul.f32 %v421_v34, %v1080_v17  ;;  %v455_v12 = vmul.f32 0.5, %v454_v50  ;;  %v548_v17 = vmul.f32 %v451_v1, %v1064_v51  ;;  %v534_v15 = vmul.f32 %v815_v52, %v533_v13  ;;  %vm1343_vm6 = vmor %vm528_vm4, %vm529_vm2 }
 0x1d1   :  { %756 = vst [vmem:[%s1398_s5 + $0x28] sm:$0xff] %v740_v49   ;;  %v507_v59 = vmul.f32 %v1204_v46, %v506_v62  ;;  %v582_v22 = vadd.f32 %v1218_v45, %v563_v53  ;;  %v531_v51 = vsel %vm1343_vm6, %v1280_v58, %v527_v11  ;;  %vm458_vm7 = vweird.f32 %v1275_v61 }
 0x1d2   :  { %v564_v14 = vmul.f32 %v1175_v42, %v545_v41  ;;  %v456_v3 = vsub.f32 1.5, %v455_v12  ;;  %v535_v33 = vmul.f32 0.5, %v534_v15  ;;  %vm508_vm8 = vweird.f32 %v1136_v18  ;;  %vm460_vm9 = vmor %vm458_vm7, %vm459_vm5 }
 0x1d3   :  { %v817_v19 = vpop.eup %816  ;;  %vm1355_vm10 = vmor %vm508_vm8, %vm509_vm3  ;;  %v567_v56 = vmul.f32 %v1175_v42, %v548_v17  ;;  %vm539_vm11 = vweird.f32 %v815_v52  ;;  %v556_v18 = vmul.f32 %v531_v51, %v1076_v16  ;;  %vm538_vm12 = vweird.f32 %v1296_v35 }
 0x1d4   :  { %v583_v57 = vadd.f32 %v1218_v45, %v564_v14  ;;  %v513_v44 = vmul.f32 %v817_v19, %v1306_v40  ;;  %v457_v23 = vmul.f32 %v813_v43, %v456_v3  ;;  %v536_v30 = vsub.f32 1.5, %v535_v33  ;;  %vm540_vm13 = vmor %vm538_vm12, %vm539_vm11 }
 0x1d5   :  { %v511_v61 = vsel %vm1355_vm10, %v1204_v46, %v507_v59  ;;  %vm519_vm14 = vweird.f32 %v817_v19  ;;  %v586_v46 = vadd.f32 %v1218_v45, %v567_v56  ;;  %vm518_vm15 = vweird.f32 %v1306_v40 }
 0x1d6   :  { %v720_v2 = vpack.c.bf16 %v583_v57, %v582_v22  ;;  %v514_v0 = vmul.f32 %v817_v19, %v513_v44  ;;  %v461_v27 = vsel %vm460_vm9, %v813_v43, %v457_v23  ;;  %v537_v29 = vmul.f32 %v815_v52, %v536_v30  ;;  %vm520_vm0 = vmor %vm518_vm15, %vm519_vm14 }
 0x1d7   :  { %v549_v58 = vmul.f32 %v461_v27, %v1096_v25  ;;  %v554_v6 = vmul.f32 %v511_v61, %v1008_v20  ;;  %v575_v16 = vmul.f32 %v1175_v42, %v556_v18 }
 0x1d8   :  { %752 = vst [vmem:[%s1398_s5 + $0x8] sm:$0xff] %v720_v2   ;;  %v515_v28 = vmul.f32 0.5, %v514_v0  ;;  %v541_v31 = vsel %vm540_vm13, %v815_v52, %v537_v29 }
 0x1d9   :  { %v568_v36 = vmul.f32 %v1175_v42, %v549_v58  ;;  %v557_v8 = vmul.f32 %v541_v31, %v1092_v24  ;;  %v573_v43 = vmul.f32 %v1175_v42, %v554_v6  ;;  %v594_v9 = vadd.f32 %v1218_v45, %v575_v16 }
 0x1da   :  { %v516_v39 = vsub.f32 1.5, %v515_v28 }
 0x1db   :  { %v587_v25 = vadd.f32 %v1218_v45, %v568_v36  ;;  %v576_v38 = vmul.f32 %v1175_v42, %v557_v8  ;;  %v592_v21 = vadd.f32 %v1218_v45, %v573_v43 }
 0x1dc   :  { %v517_v37 = vmul.f32 %v817_v19, %v516_v39 }
 0x1dd   :  { %v730_v35 = vpack.c.bf16 %v587_v25, %v586_v46  ;;  %v595_v40 = vadd.f32 %v1218_v45, %v576_v38 }
 0x1de   :  { %v521_v55 = vsel %vm520_vm0, %v817_v19, %v517_v37 }
 0x1df   :  { %v555_v20 = vmul.f32 %v521_v55, %v1106_v63  ;;  %754 = vst [vmem:[%s1398_s5 + $0x18] sm:$0xff] %v730_v35   ;;  %v750_v54 = vpack.c.bf16 %v595_v40, %v594_v9 }
 0x1e1   :  { %v574_v24 = vmul.f32 %v1175_v42, %v555_v20  ;;  %758 = vst [vmem:[%s1398_s5 + $0x38] sm:$0xff] %v750_v54  }
 0x1e3   :  { %v593_v4 = vadd.f32 %v1218_v45, %v574_v24 }
 0x1e5   :  { %v745_v63 = vpack.c.bf16 %v593_v4, %v592_v21 }
 0x1e7   :  { %757 = vst [vmem:[%s1398_s5 + $0x30] sm:$0xff] %v745_v63  }

// kernel: _ampgnn_forward_jit.6
= control target key start
LH: loop header
LB: loop body
LE: loop exit
PB: predicated region body
PF: predicated region fallthrough
CT: control target
= control target key end

     0   :  { %v1255_v0 = vmov 0.0   ;;  %s1950_s0 = inlined_call_operand.<no memory space> [shape: s32[1], index: 0, kind: input, shape index: {}]   ;;  %s1951_s1 = inlined_call_operand.<no memory space> [shape: s32[1], index: 1, kind: input, shape index: {}]   ;;  %s1952_s3 = inlined_call_operand.vmem [shape: bf16[128,128], index: 3, kind: input, shape index: {}]   ;;  %s1953_s4 = inlined_call_operand.vmem [shape: bf16[128,128], index: 4, kind: input, shape index: {}]   ;;  %s1954_s5 = inlined_call_operand.vmem [shape: f32[1,128], index: 5, kind: input, shape index: {}]   ;;  %s1955_s6 = inlined_call_operand.vmem [shape: f32[1,128], index: 6, kind: input, shape index: {}]   ;;  %s1956_s7 = inlined_call_operand.vmem [shape: f32[1,128], index: 7, kind: input, shape index: {}]   ;;  %s1957_s8 = inlined_call_operand.vmem [shape: bf16[128,128], index: 8, kind: output, shape index: {}]   ;;  %s1958_s2 = inlined_call_operand.vmem [shape: bf16[128,128], index: 2, kind: input, shape index: {}]  }
   0x1   :  { %13 = sst [smem:[#allocation4]] %s1950_s0  ;;  %p43_p0 = scmp.lt.s32.totalorder %s1950_s0, 0  ;;  %53 = vst [vmem:[#allocation2 + $0x30] sm:$0xff] %v1255_v0 }
   0x2   :  { %54 = vst [vmem:[#allocation2] sm:$0xff] %v1255_v0  ;;  %p962_p1 = scmp.le.s32.totalorder %s1951_s1, 0 }
   0x3   :  { %s1974_s0 = smov (!%p43_p0, %s1950_s0), 0  ;;  %55 = vst [vmem:[#allocation2 + $0x58] sm:$0xff] %v1255_v0 }
   0x4   :  { %56 = vst [vmem:[#allocation2 + $0x18] sm:$0xff] %v1255_v0  ;;  %s960_s11 = sshll.u32 %s1974_s0, 2  ;;  %s75_s0 = sld [smem:[#allocation4]] (!%p962_p1) }
   0x5   :  { %57 = vst [vmem:[#allocation2 + $0x50] sm:$0xff] %v1255_v0  ;;  %s1313_s14 = scalar_lea.vmem %s1958_s2, %s960_s11 }
   0x6   :  { %58 = vst [vmem:[#allocation2 + $0x68] sm:$0xff] %v1255_v0 }
   0x7   :  { %59 = vst [vmem:[#allocation2 + $0x8] sm:$0xff] %v1255_v0 }
   0x8   :  { %60 = vst [vmem:[#allocation2 + $0x48] sm:$0xff] %v1255_v0 }
   0x9   :  { %61 = vst [vmem:[#allocation2 + $0x40] sm:$0xff] %v1255_v0 }
   0xa   :  { %62 = vst [vmem:[#allocation2 + $0x20] sm:$0xff] %v1255_v0  ;;  %s963_s17 = sshll.u32 (!%p962_p1), %s75_s0, 7 }
   0xb   :  { %63 = vst [vmem:[#allocation2 + $0x10] sm:$0xff] %v1255_v0  ;;  %s77_s2 = sshra.s32 (!%p962_p1), %s963_s17, 3 }
   0xc   :  { %64 = vst [vmem:[#allocation2 + $0x38] sm:$0xff] %v1255_v0  ;;  %73 = sbr.rel (%p962_p1) target bundleno = 210 (0xd2), region = 33  ;;  %s964_s18 = sshll.u32 (!%p962_p1), %s77_s2, 2 }
   0xd   :  { %65 = vst [vmem:[#allocation2 + $0x60] sm:$0xff] %v1255_v0  ;;  %s1321_s21 = scalar_lea.vmem (!%p962_p1), %s1952_s3, %s964_s18 }
   0xe   :  { %66 = vst [vmem:[#allocation2 + $0x70] sm:$0xff] %v1255_v0 }
   0xf   :  { %67 = vst [vmem:[#allocation2 + $0x78] sm:$0xff] %v1255_v0 }
  0x10   :  { %68 = vst [vmem:[#allocation2 + $0x28] sm:$0xff] %v1255_v0 }
  0x11   :  { %v1068_v1 = vld [vmem:[%s1321_s21 + $0x38] sm:$0xff]  ;;  %v1067_v2 = vld [vmem:[%s1321_s21 + $0x30] sm:$0xff]  ;;  %v1066_v3 = vld [vmem:[%s1321_s21 + $0x28] sm:$0xff] }
  0x12   :  { %225 = vmatpush.bf16.msra.mxu0 %v1068_v1  ;;  %1171 = vmatpush.bf16.msra.mxu1 %v1068_v1  ;;  %v1065_v4 = vld [vmem:[%s1321_s21 + $0x20] sm:$0xff]  ;;  %v1064_v5 = vld [vmem:[%s1321_s21 + $0x18] sm:$0xff]  ;;  %v1063_v6 = vld [vmem:[%s1321_s21 + $0x10] sm:$0xff] }
  0x13   :  { %1172 = vmatpush.bf16.msra.mxu2 %v1068_v1  ;;  %1173 = vmatpush.bf16.msra.mxu3 %v1068_v1  ;;  %v1062_v7 = vld [vmem:[%s1321_s21 + $0x8] sm:$0xff]  ;;  %v1061_v8 = vld [vmem:[%s1321_s21] sm:$0xff]  ;;  %v1071_v10 = vld [vmem:[%s1313_s14 + $0x10] sm:$0xff] }
  0x14   :  { %v1069_v9 = vld [vmem:[%s1313_s14] sm:$0xff]  ;;  %v1075_v12 = vld [vmem:[%s1313_s14 + $0x30] sm:$0xff]  ;;  %v1070_v13 = vld [vmem:[%s1313_s14 + $0x8] sm:$0xff] }
  0x15   :  { %v1073_v11 = vld [vmem:[%s1313_s14 + $0x20] sm:$0xff]  ;;  %v1072_v14 = vld [vmem:[%s1313_s14 + $0x18] sm:$0xff]  ;;  %v1074_v15 = vld [vmem:[%s1313_s14 + $0x28] sm:$0xff] }
  0x16   :  { %226 = vmatpush.bf16.msra.mxu0 %v1067_v2  ;;  %1174 = vmatpush.bf16.msra.mxu1 %v1067_v2  ;;  %v1076_v16 = vld [vmem:[%s1313_s14 + $0x38] sm:$0xff]  ;;  %v97_v17 = vld [vmem:[#allocation2 + $0x30] sm:$0xff]  ;;  %v105_v23 = vld [vmem:[#allocation2 + $0x40] sm:$0xff] }
  0x17   :  { %1175 = vmatpush.bf16.msra.mxu2 %v1067_v2  ;;  %1176 = vmatpush.bf16.msra.mxu3 %v1067_v2  ;;  %v101_v18 = vld [vmem:[#allocation2 + $0x50] sm:$0xff]  ;;  %v109_v24 = vld [vmem:[#allocation2 + $0x60] sm:$0xff]  ;;  %v102_v26 = vld [vmem:[#allocation2 + $0x68] sm:$0xff] }
  0x18   :  { %v98_v25 = vld [vmem:[#allocation2] sm:$0xff]  ;;  %v110_v36 = vld [vmem:[#allocation2 + $0x70] sm:$0xff]  ;;  %v99_v37 = vld [vmem:[#allocation2 + $0x58] sm:$0xff] }
  0x19   :  { %v106_v35 = vld [vmem:[#allocation2 + $0x20] sm:$0xff]  ;;  %v103_v38 = vld [vmem:[#allocation2 + $0x8] sm:$0xff]  ;;  %v107_v47 = vld [vmem:[#allocation2 + $0x10] sm:$0xff] }
  0x1a   :  { %227 = vmatpush.bf16.msra.mxu0 %v1066_v3  ;;  %1177 = vmatpush.bf16.msra.mxu1 %v1066_v3  ;;  %v111_v48 = vld [vmem:[#allocation2 + $0x78] sm:$0xff]  ;;  %v104_v50 = vld [vmem:[#allocation2 + $0x48] sm:$0xff] }
  0x1b   :  { %1178 = vmatpush.bf16.msra.mxu2 %v1066_v3  ;;  %1179 = vmatpush.bf16.msra.mxu3 %v1066_v3  ;;  %v100_v49 = vld [vmem:[#allocation2 + $0x18] sm:$0xff]  ;;  %v112_v60 = vld [vmem:[#allocation2 + $0x28] sm:$0xff] }
  0x1c   :  { %v108_v59 = vld [vmem:[#allocation2 + $0x38] sm:$0xff] }
  0x1e   :  { %228 = vmatpush.bf16.msra.mxu0 %v1065_v4  ;;  %1180 = vmatpush.bf16.msra.mxu1 %v1065_v4 }
  0x1f   :  { %1181 = vmatpush.bf16.msra.mxu2 %v1065_v4  ;;  %1182 = vmatpush.bf16.msra.mxu3 %v1065_v4 }
  0x22   :  { %229 = vmatpush.bf16.msra.mxu0 %v1064_v5  ;;  %1183 = vmatpush.bf16.msra.mxu1 %v1064_v5 }
  0x23   :  { %1184 = vmatpush.bf16.msra.mxu2 %v1064_v5  ;;  %1185 = vmatpush.bf16.msra.mxu3 %v1064_v5 }
  0x26   :  { %230 = vmatpush.bf16.msra.mxu0 %v1063_v6  ;;  %1186 = vmatpush.bf16.msra.mxu1 %v1063_v6 }
  0x27   :  { %1187 = vmatpush.bf16.msra.mxu2 %v1063_v6  ;;  %1188 = vmatpush.bf16.msra.mxu3 %v1063_v6 }
  0x2a   :  { %231 = vmatpush.bf16.msra.mxu0 %v1062_v7  ;;  %1189 = vmatpush.bf16.msra.mxu1 %v1062_v7 }
  0x2b   :  { %1190 = vmatpush.bf16.msra.mxu2 %v1062_v7  ;;  %1191 = vmatpush.bf16.msra.mxu3 %v1062_v7 }
  0x2e   :  { %232 = vmatpush.bf16.msra.mxu0 %v1061_v8  ;;  %1192 = vmatpush.bf16.msra.mxu1 %v1061_v8 }
  0x2f   :  { %1193 = vmatpush.bf16.msra.mxu2 %v1061_v8  ;;  %1194 = vmatpush.bf16.msra.mxu3 %v1061_v8 }
  0x31   :  { %233 = vmatmul.bf16.vlgmr.msra.gmra.mxu0 %v1069_v9  ;;  %243 = vmatmul.bf16.vlgmr.msra.gmra.mxu1 %v1071_v10 }
  0x32   :  { %253 = vmatmul.bf16.vlgmr.msra.gmra.mxu2 %v1073_v11  ;;  %263 = vmatmul.bf16.vlgmr.msra.gmra.mxu3 %v1075_v12 }
  0x41   :  { %238 = vmatmul.bf16.gmra.mxu0 %v1070_v13  ;;  %248 = vmatmul.bf16.gmra.mxu1 %v1072_v14 }
  0x42   :  { %258 = vmatmul.bf16.gmra.mxu2 %v1074_v15  ;;  %268 = vmatmul.bf16.gmra.mxu3 %v1076_v16 }
  0xae   :  { %v234_v19 = vpop.f32.mrf.mxu0  ;;  %v244_v20 = vpop.f32.mrf.mxu1 }
  0xaf   :  { %v274_v21 = vadd.f32 %v234_v19, %v97_v17  ;;  %v278_v22 = vadd.f32 %v244_v20, %v101_v18 }
  0xb1   :  { %290 = vst [vmem:[#allocation2 + $0x30] sm:$0xff] %v274_v21 }
  0xb2   :  { %294 = vst [vmem:[#allocation2 + $0x50] sm:$0xff] %v278_v22 }
  0xb5   :  { %v254_v27 = vpop.f32.mrf.mxu2  ;;  %v264_v28 = vpop.f32.mrf.mxu3 }
  0xb6   :  { %v282_v29 = vadd.f32 %v254_v27, %v105_v23  ;;  %v286_v30 = vadd.f32 %v264_v28, %v109_v24  ;;  %v236_v31 = vpop.f32.mrf.mxu0  ;;  %v246_v32 = vpop.f32.mrf.mxu1 }
  0xb7   :  { %v275_v33 = vadd.f32 %v236_v31, %v98_v25  ;;  %v279_v34 = vadd.f32 %v246_v32, %v102_v26 }
  0xb8   :  { %298 = vst [vmem:[#allocation2 + $0x40] sm:$0xff] %v282_v29 }
  0xb9   :  { %302 = vst [vmem:[#allocation2 + $0x60] sm:$0xff] %v286_v30 }
  0xba   :  { %291 = vst [vmem:[#allocation2] sm:$0xff] %v275_v33 }
  0xbb   :  { %295 = vst [vmem:[#allocation2 + $0x68] sm:$0xff] %v279_v34 }
  0xbd   :  { %v256_v39 = vpop.f32.mrf.mxu2  ;;  %v266_v40 = vpop.f32.mrf.mxu3 }
  0xbe   :  { %v283_v41 = vadd.f32 %v256_v39, %v106_v35  ;;  %v287_v42 = vadd.f32 %v266_v40, %v110_v36  ;;  %v239_v43 = vpop.f32.mrf.mxu0  ;;  %v249_v44 = vpop.f32.mrf.mxu1 }
  0xbf   :  { %v276_v45 = vadd.f32 %v239_v43, %v99_v37  ;;  %v280_v46 = vadd.f32 %v249_v44, %v103_v38 }
  0xc0   :  { %299 = vst [vmem:[#allocation2 + $0x20] sm:$0xff] %v283_v41 }
  0xc1   :  { %303 = vst [vmem:[#allocation2 + $0x70] sm:$0xff] %v287_v42 }
  0xc2   :  { %292 = vst [vmem:[#allocation2 + $0x58] sm:$0xff] %v276_v45 }
  0xc3   :  { %296 = vst [vmem:[#allocation2 + $0x8] sm:$0xff] %v280_v46 }
  0xc5   :  { %v259_v51 = vpop.f32.mrf.mxu2  ;;  %v269_v52 = vpop.f32.mrf.mxu3 }
  0xc6   :  { %v284_v53 = vadd.f32 %v259_v51, %v107_v47  ;;  %v288_v54 = vadd.f32 %v269_v52, %v111_v48  ;;  %v241_v55 = vpop.f32.mrf.mxu0  ;;  %v251_v56 = vpop.f32.mrf.mxu1 }
  0xc7   :  { %v277_v57 = vadd.f32 %v241_v55, %v100_v49  ;;  %v281_v58 = vadd.f32 %v251_v56, %v104_v50 }
  0xc8   :  { %300 = vst [vmem:[#allocation2 + $0x10] sm:$0xff] %v284_v53 }
  0xc9   :  { %304 = vst [vmem:[#allocation2 + $0x78] sm:$0xff] %v288_v54 }
  0xca   :  { %293 = vst [vmem:[#allocation2 + $0x18] sm:$0xff] %v277_v57 }
  0xcb   :  { %297 = vst [vmem:[#allocation2 + $0x48] sm:$0xff] %v281_v58 }
  0xcd   :  { %v261_v61 = vpop.f32.mrf.mxu2  ;;  %v271_v62 = vpop.f32.mrf.mxu3 }
  0xce   :  { %v285_v63 = vadd.f32 %v261_v61, %v108_v59  ;;  %v289_v0 = vadd.f32 %v271_v62, %v112_v60 }
  0xd0   :  { %301 = vst [vmem:[#allocation2 + $0x38] sm:$0xff] %v285_v63 }
  0xd1   :  { %305 = vst [vmem:[#allocation2 + $0x28] sm:$0xff] %v289_v0 }
  0xd2 PF:  { %v1084_v1 = vld [vmem:[%s1953_s4 + $0x38] sm:$0xff]  ;;  %v1083_v2 = vld [vmem:[%s1953_s4 + $0x30] sm:$0xff]  ;;  %v1082_v3 = vld [vmem:[%s1953_s4 + $0x28] sm:$0xff] }
  0xd3   :  { %454 = vmatpush.bf16.msra.mxu0 %v1084_v1  ;;  %1195 = vmatpush.bf16.msra.mxu1 %v1084_v1  ;;  %v1081_v4 = vld [vmem:[%s1953_s4 + $0x20] sm:$0xff]  ;;  %v1080_v5 = vld [vmem:[%s1953_s4 + $0x18] sm:$0xff]  ;;  %v1079_v7 = vld [vmem:[%s1953_s4 + $0x10] sm:$0xff] }
  0xd4   :  { %1196 = vmatpush.bf16.msra.mxu2 %v1084_v1  ;;  %1197 = vmatpush.bf16.msra.mxu3 %v1084_v1  ;;  %v1357_v6 = vld [vmem:[%s1952_s3] sm:$0xff]   ;;  %v1365_v8 = vld [vmem:[%s1952_s3 + $0x10] sm:$0xff]   ;;  %v1078_v12 = vld [vmem:[%s1953_s4 + $0x8] sm:$0xff] }
  0xd5   :  { %v1370_v9 = vld [vmem:[%s1952_s3 + $0x20] sm:$0xff]   ;;  %v1375_v10 = vld [vmem:[%s1952_s3 + $0x30] sm:$0xff]   ;;  %v1087_v11 = vunpack.c.l.bf16 %v1357_v6  ;;  %v1088_v13 = vunpack.c.h.bf16 %v1357_v6  ;;  %v1095_v16 = vunpack.c.l.bf16 %v1365_v8  ;;  %v1096_v17 = vunpack.c.h.bf16 %v1365_v8  ;;  %v351_v20 = vld [vmem:[#allocation2 + $0x68] sm:$0xff] }
  0xd6   :  { %v346_v14 = vld [vmem:[#allocation2 + $0x30] sm:$0xff]  ;;  %v347_v15 = vld [vmem:[#allocation2] sm:$0xff]  ;;  %v1103_v18 = vunpack.c.l.bf16 %v1370_v9  ;;  %v1104_v21 = vunpack.c.h.bf16 %v1370_v9  ;;  %v1111_v23 = vunpack.c.l.bf16 %v1375_v10  ;;  %v1112_v24 = vunpack.c.h.bf16 %v1375_v10  ;;  %v1410_v41 = vld [vmem:[%s1952_s3 + $0x8] sm:$0xff]  }
  0xd7   :  { %455 = vmatpush.bf16.msra.mxu0 %v1083_v2  ;;  %1198 = vmatpush.bf16.msra.mxu1 %v1083_v2  ;;  %v350_v19 = vld [vmem:[#allocation2 + $0x50] sm:$0xff]  ;;  %v354_v22 = vld [vmem:[#allocation2 + $0x40] sm:$0xff]  ;;  %v362_v28 = vadd.f32 %v1087_v11, %v346_v14  ;;  %v363_v29 = vadd.f32 %v1088_v13, %v347_v15  ;;  %v367_v31 = vadd.f32 %v1096_v17, %v351_v20  ;;  %v1415_v42 = vld [vmem:[%s1952_s3 + $0x18] sm:$0xff]   ;;  %v1091_v45 = vunpack.c.l.bf16 %v1410_v41 }
  0xd8   :  { %1199 = vmatpush.bf16.msra.mxu2 %v1083_v2  ;;  %1200 = vmatpush.bf16.msra.mxu3 %v1083_v2  ;;  %v355_v25 = vld [vmem:[#allocation2 + $0x20] sm:$0xff]  ;;  %v359_v27 = vld [vmem:[#allocation2 + $0x70] sm:$0xff]  ;;  %v366_v30 = vadd.f32 %v1095_v16, %v350_v19  ;;  %v370_v32 = vadd.f32 %v1103_v18, %v354_v22  ;;  %v1420_v43 = vld [vmem:[%s1952_s3 + $0x28] sm:$0xff]   ;;  %v1092_v46 = vunpack.c.h.bf16 %v1410_v41  ;;  %v1099_v49 = vunpack.c.l.bf16 %v1415_v42 }
  0xd9   :  { %v358_v26 = vld [vmem:[#allocation2 + $0x60] sm:$0xff]  ;;  %v371_v34 = vadd.f32 %v1104_v21, %v355_v25  ;;  %v375_v36 = vadd.f32 %v1112_v24, %v359_v27  ;;  %v378_v37 = vpack.c.bf16 %v363_v29, %v362_v28  ;;  %v1425_v44 = vld [vmem:[%s1952_s3 + $0x38] sm:$0xff]   ;;  %v1100_v50 = vunpack.c.h.bf16 %v1415_v42  ;;  %v356_v53 = vld [vmem:[#allocation2 + $0x10] sm:$0xff] }
  0xda   :  { %v1077_v33 = vld [vmem:[%s1953_s4] sm:$0xff]  ;;  %v374_v35 = vadd.f32 %v1111_v23, %v358_v26  ;;  %v380_v38 = vpack.c.bf16 %v367_v31, %v366_v30  ;;  %v348_v47 = vld [vmem:[#allocation2 + $0x58] sm:$0xff]  ;;  %v1107_v51 = vunpack.c.l.bf16 %v1420_v43  ;;  %v1108_v52 = vunpack.c.h.bf16 %v1420_v43  ;;  %v352_v56 = vld [vmem:[#allocation2 + $0x8] sm:$0xff] }
  0xdb   :  { %456 = vmatpush.bf16.msra.mxu0 %v1082_v3  ;;  %1201 = vmatpush.bf16.msra.mxu1 %v1082_v3  ;;  %v382_v39 = vpack.c.bf16 %v371_v34, %v370_v32  ;;  %v349_v48 = vld [vmem:[#allocation2 + $0x18] sm:$0xff]  ;;  %v1115_v54 = vunpack.c.l.bf16 %v1425_v44  ;;  %v1116_v55 = vunpack.c.h.bf16 %v1425_v44  ;;  %v353_v57 = vld [vmem:[#allocation2 + $0x48] sm:$0xff]  ;;  %v364_v61 = vadd.f32 %v1091_v45, %v348_v47  ;;  %v1454_v15 = vld [vmem:[%s1954_s5] ss:$0 sm:$0xff] }
  0xdc   :  { %1202 = vmatpush.bf16.msra.mxu2 %v1082_v3  ;;  %1203 = vmatpush.bf16.msra.mxu3 %v1082_v3  ;;  %v384_v40 = vpack.c.bf16 %v375_v36, %v374_v35  ;;  %v357_v58 = vld [vmem:[#allocation2 + $0x38] sm:$0xff]  ;;  %v361_v60 = vld [vmem:[#allocation2 + $0x28] sm:$0xff]  ;;  %v365_v62 = vadd.f32 %v1092_v46, %v349_v48  ;;  %v368_v63 = vadd.f32 %v1099_v49, %v352_v56  ;;  %v537_v44 = vlaneseq }
  0xdd   :  { %v360_v59 = vld [vmem:[#allocation2 + $0x78] sm:$0xff]  ;;  %v369_v0 = vadd.f32 %v1100_v50, %v353_v57  ;;  %v372_v1 = vadd.f32 %v1107_v51, %v356_v53  ;;  %v373_v2 = vadd.f32 %v1108_v52, %v357_v58 }
  0xde   :  { %v376_v3 = vadd.f32 %v1115_v54, %v360_v59 }
  0xdf   :  { %457 = vmatpush.bf16.msra.mxu0 %v1081_v4  ;;  %1204 = vmatpush.bf16.msra.mxu1 %v1081_v4 }
  0xe0   :  { %1205 = vmatpush.bf16.msra.mxu2 %v1081_v4  ;;  %1206 = vmatpush.bf16.msra.mxu3 %v1081_v4  ;;  %v377_v4 = vadd.f32 %v1116_v55, %v361_v60 }
  0xe2   :  { %v385_v14 = vpack.c.bf16 %v377_v4, %v376_v3 }
  0xe3   :  { %458 = vmatpush.bf16.msra.mxu0 %v1080_v5  ;;  %1207 = vmatpush.bf16.msra.mxu1 %v1080_v5 }
  0xe4   :  { %1208 = vmatpush.bf16.msra.mxu2 %v1080_v5  ;;  %1209 = vmatpush.bf16.msra.mxu3 %v1080_v5  ;;  %v379_v5 = vpack.c.bf16 %v365_v62, %v364_v61 }
  0xe7   :  { %459 = vmatpush.bf16.msra.mxu0 %v1079_v7  ;;  %1210 = vmatpush.bf16.msra.mxu1 %v1079_v7 }
  0xe8   :  { %1211 = vmatpush.bf16.msra.mxu2 %v1079_v7  ;;  %1212 = vmatpush.bf16.msra.mxu3 %v1079_v7  ;;  %v381_v7 = vpack.c.bf16 %v369_v0, %v368_v63 }
  0xeb   :  { %460 = vmatpush.bf16.msra.mxu0 %v1078_v12  ;;  %1213 = vmatpush.bf16.msra.mxu1 %v1078_v12 }
  0xec   :  { %1214 = vmatpush.bf16.msra.mxu2 %v1078_v12  ;;  %1215 = vmatpush.bf16.msra.mxu3 %v1078_v12  ;;  %v383_v12 = vpack.c.bf16 %v373_v2, %v372_v1 }
  0xef   :  { %461 = vmatpush.bf16.msra.mxu0 %v1077_v33  ;;  %1216 = vmatpush.bf16.msra.mxu1 %v1077_v33 }
  0xf0   :  { %1217 = vmatpush.bf16.msra.mxu2 %v1077_v33  ;;  %1218 = vmatpush.bf16.msra.mxu3 %v1077_v33 }
  0xf2   :  { %462 = vmatmul.bf16.vlgmr.msra.gmra.mxu0 %v378_v37  ;;  %472 = vmatmul.bf16.vlgmr.msra.gmra.mxu1 %v380_v38 }
  0xf3   :  { %482 = vmatmul.bf16.vlgmr.msra.gmra.mxu2 %v382_v39  ;;  %492 = vmatmul.bf16.vlgmr.msra.gmra.mxu3 %v384_v40 }
 0x102   :  { %467 = vmatmul.bf16.gmra.mxu0 %v379_v5  ;;  %477 = vmatmul.bf16.gmra.mxu1 %v381_v7 }
 0x103   :  { %487 = vmatmul.bf16.gmra.mxu2 %v383_v12  ;;  %497 = vmatmul.bf16.gmra.mxu3 %v385_v14 }
 0x16f   :  { %v463_v19 = vpop.f32.mrf.mxu0  ;;  %v473_v20 = vpop.f32.mrf.mxu1 }
 0x170   :  { %v464_v22 = vadd.f32 %v1454_v15, %v463_v19  ;;  %v474_v25 = vadd.f32 %v1454_v15, %v473_v20 }
 0x172   :  { %v503_v26 = vmax.f32 %v464_v22, 0.0  ;;  %v507_v27 = vmax.f32 %v474_v25, 0.0 }
 0x174   :  { %v1460_v28 = vadd.f32 %v1095_v16, %v507_v27  ;;  %v1464_v29 = vadd.f32 %v1087_v11, %v503_v26 }
 0x176   :  { %v483_v30 = vpop.f32.mrf.mxu2  ;;  %v493_v31 = vpop.f32.mrf.mxu3  ;;  %548 = vadd.xlane.f32.xlu2 %v1460_v28  ;;  %540 = vadd.xlane.f32.xlu0 %v1464_v29 }
 0x177   :  { %v484_v32 = vadd.f32 %v1454_v15, %v483_v30  ;;  %v494_v33 = vadd.f32 %v1454_v15, %v493_v31  ;;  %v465_v34 = vpop.f32.mrf.mxu0  ;;  %v475_v37 = vpop.f32.mrf.mxu1 }
 0x178   :  { %v466_v11 = vadd.f32 %v1454_v15, %v465_v34  ;;  %v476_v38 = vadd.f32 %v1454_v15, %v475_v37 }
 0x179   :  { %v511_v35 = vmax.f32 %v484_v32, 0.0  ;;  %v515_v36 = vmax.f32 %v494_v33, 0.0 }
 0x17a   :  { %v504_v53 = vmax.f32 %v466_v11, 0.0  ;;  %v508_v56 = vmax.f32 %v476_v38, 0.0 }
 0x17b   :  { %v1472_v16 = vadd.f32 %v1103_v18, %v511_v35  ;;  %v1478_v39 = vadd.f32 %v1111_v23, %v515_v36 }
 0x17c   :  { %v1491_v60 = vadd.f32 %v1096_v17, %v508_v56  ;;  %v1495_v61 = vadd.f32 %v1088_v13, %v504_v53 }
 0x17e   :  { %v485_v40 = vpop.f32.mrf.mxu2  ;;  %v495_v47 = vpop.f32.mrf.mxu3  ;;  %556 = vadd.xlane.f32.xlu2 %v1472_v16  ;;  %564 = vadd.xlane.f32.xlu0 %v1478_v39 }
 0x17f   :  { %v496_v48 = vadd.f32 %v1454_v15, %v495_v47  ;;  %v468_v18 = vpop.f32.mrf.mxu0  ;;  %v486_v23 = vadd.f32 %v1454_v15, %v485_v40  ;;  %v478_v17 = vpop.f32.mrf.mxu1 }
 0x180   :  { %v469_v58 = vadd.f32 %v1454_v15, %v468_v18  ;;  %v479_v6 = vadd.f32 %v1454_v15, %v478_v17 }
 0x181   :  { %v516_v57 = vmax.f32 %v496_v48, 0.0 }
 0x182   :  { %v505_v62 = vmax.f32 %v469_v58, 0.0  ;;  %v509_v2 = vmax.f32 %v479_v6, 0.0 }
 0x183   :  { %v1486_v59 = vadd.f32 %v1112_v24, %v516_v57  ;;  %v512_v24 = vmax.f32 %v486_v23, 0.0 }
 0x184   :  { %v1503_v8 = vadd.f32 %v1091_v45, %v505_v62  ;;  %v1520_v9 = vadd.f32 %v1099_v49, %v509_v2 }
 0x185   :  { %566 = vadd.xlane.f32.xlu1 %v1486_v59  ;;  %v1508_v13 = vadd.f32 %v1104_v21, %v512_v24 }
 0x186   :  { %v488_v63 = vpop.f32.mrf.mxu2  ;;  %550 = vadd.xlane.f32.xlu2 %v1491_v60  ;;  %542 = vadd.xlane.f32.xlu0 %v1495_v61  ;;  %v498_v10 = vpop.f32.mrf.mxu3 }
 0x187   :  { %v489_v0 = vadd.f32 %v1454_v15, %v488_v63  ;;  %v470_v7 = vpop.f32.mrf.mxu0  ;;  %v499_v12 = vadd.f32 %v1454_v15, %v498_v10  ;;  %v480_v26 = vpop.f32.mrf.mxu1 }
 0x188   :  { %v471_v19 = vadd.f32 %v1454_v15, %v470_v7  ;;  %v481_v43 = vadd.f32 %v1454_v15, %v480_v26 }
 0x189   :  { %v513_v1 = vmax.f32 %v489_v0, 0.0  ;;  %v517_v22 = vmax.f32 %v499_v12, 0.0 }
 0x18a   :  { %v506_v25 = vmax.f32 %v471_v19, 0.0  ;;  %v510_v30 = vmax.f32 %v481_v43, 0.0 }
 0x18b   :  { %v1516_v14 = vadd.f32 %v1107_v51, %v513_v1  ;;  %v1533_v49 = vadd.f32 %v1115_v54, %v517_v22 }
 0x18c   :  { %v1549_v54 = vadd.f32 %v1100_v50, %v510_v30 }
 0x18d   :  { %544 = vadd.xlane.f32.xlu1 %v1503_v8 }
 0x18e   :  { %v490_v3 = vpop.f32.mrf.mxu2  ;;  %558 = vadd.xlane.f32.xlu0 %v1508_v13  ;;  %v500_v5 = vpop.f32.mrf.mxu3 }
 0x18f   :  { %v491_v4 = vadd.f32 %v1454_v15, %v490_v3  ;;  %v501_v21 = vadd.f32 %v1454_v15, %v500_v5 }
 0x191   :  { %v514_v45 = vmax.f32 %v491_v4, 0.0  ;;  %v518_v51 = vmax.f32 %v501_v21, 0.0 }
 0x193   :  { %v1526_v20 = vadd.f32 %v1108_v52, %v514_v45  ;;  %v1537_v27 = vadd.f32 %v1116_v55, %v518_v51  ;;  %v1542_v52 = vadd.f32 %v1092_v46, %v506_v25  ;;  %v1552_v55 = vand.u32 127, %v537_v44 }
 0x195   :  { %562 = vadd.xlane.f32.xlu2 %v1526_v20  ;;  %560 = vadd.xlane.f32.xlu1 %v1516_v14  ;;  %vm539_vm0 = vcmp.lt.s32.totalorder %v1552_v55, 32 }
 0x196   :  { %552 = vadd.xlane.f32.xlu0 %v1520_v9 }
 0x19d   :  { %568 = vadd.xlane.f32.xlu2 %v1533_v49  ;;  %546 = vadd.xlane.f32.xlu1 %v1542_v52 }
 0x19e   :  { %570 = vadd.xlane.f32.xlu0 %v1537_v27 }
 0x1a5   :  { %554 = vadd.xlane.f32.xlu1 %v1549_v54 }
 0x1e9   :  { %v549_v15 = vpop.xlane.xlu2 %548  ;;  %v541_v41 = vpop.xlane.xlu0 %540 }
 0x1ea   :  { %v576_v46 = vmul.f32 0.03125, %v549_v15  ;;  %v572_v31 = vmul.f32 0.03125, %v541_v41 }
 0x1ec   :  { %v592_v32 = vsub.f32 %v1460_v28, %v576_v46  ;;  %v588_v33 = vsub.f32 %v1464_v29, %v572_v31 }
 0x1ee   :  { %v1559_v42 = vsel %vm539_vm0, %v592_v32, 0.0  ;;  %v1563_v50 = vsel %vm539_vm0, %v588_v33, 0.0 }
 0x1ef   :  { %v624_v34 = vmul.f32 %v1559_v42, %v1559_v42  ;;  %v620_v35 = vmul.f32 %v1563_v50, %v1563_v50 }
 0x1f1   :  { %644 = vadd.xlane.f32.xlu2 %v624_v34  ;;  %v557_v36 = vpop.xlane.xlu2 %556  ;;  %636 = vadd.xlane.f32.xlu1 %v620_v35  ;;  %v565_v28 = vpop.xlane.xlu0 %564 }
 0x1f2   :  { %v580_v37 = vmul.f32 0.03125, %v557_v36  ;;  %v584_v29 = vmul.f32 0.03125, %v565_v28 }
 0x1f4   :  { %v596_v11 = vsub.f32 %v1472_v16, %v580_v37  ;;  %v600_v38 = vsub.f32 %v1478_v39, %v584_v29 }
 0x1f6   :  { %v1573_v40 = vsel %vm539_vm0, %v596_v11, 0.0  ;;  %v1577_v47 = vsel %vm539_vm0, %v600_v38, 0.0 }
 0x1f7   :  { %v628_v48 = vmul.f32 %v1573_v40, %v1573_v40  ;;  %v632_v53 = vmul.f32 %v1577_v47, %v1577_v47 }
 0x1f8   :  { %v567_v56 = vpop.xlane.xlu1 %566 }
 0x1f9   :  { %v551_v18 = vpop.xlane.xlu2 %550  ;;  %652 = vadd.xlane.f32.xlu0 %v628_v48  ;;  %660 = vadd.xlane.f32.xlu1 %v632_v53  ;;  %v543_v16 = vpop.xlane.xlu0 %542 }
 0x1fa   :  { %v577_v39 = vmul.f32 0.03125, %v551_v18  ;;  %v573_v57 = vmul.f32 0.03125, %v543_v16 }
 0x1fc   :  { %v593_v58 = vsub.f32 %v1491_v60, %v577_v39  ;;  %v589_v23 = vsub.f32 %v1495_v61, %v573_v57 }
 0x1fe   :  { %v1587_v62 = vsel %vm539_vm0, %v593_v58, 0.0  ;;  %v1591_v63 = vsel %vm539_vm0, %v589_v23, 0.0 }
 0x1ff   :  { %v625_v10 = vmul.f32 %v1587_v62, %v1587_v62  ;;  %v621_v24 = vmul.f32 %v1591_v63, %v1591_v63 }
 0x200   :  { %v545_v0 = vpop.xlane.xlu1 %544 }
 0x201   :  { %v574_v17 = vmul.f32 0.03125, %v545_v0  ;;  %646 = vadd.xlane.f32.xlu0 %v625_v10  ;;  %638 = vadd.xlane.f32.xlu2 %v621_v24  ;;  %v559_v60 = vpop.xlane.xlu0 %558 }
 0x202   :  { %v581_v61 = vmul.f32 0.03125, %v559_v60 }
 0x203   :  { %v590_v6 = vsub.f32 %v1503_v8, %v574_v17 }
 0x204   :  { %v597_v1 = vsub.f32 %v1508_v13, %v581_v61 }
 0x205   :  { %v1601_v2 = vsel %vm539_vm0, %v590_v6, 0.0 }
 0x206   :  { %v1605_v3 = vsel %vm539_vm0, %v597_v1, 0.0  ;;  %v622_v4 = vmul.f32 %v1601_v2, %v1601_v2 }
 0x207   :  { %v629_v5 = vmul.f32 %v1605_v3, %v1605_v3 }
 0x208   :  { %v563_v7 = vpop.xlane.xlu2 %562  ;;  %v561_v45 = vpop.xlane.xlu1 %560 }
 0x209   :  { %v583_v12 = vmul.f32 0.03125, %v563_v7  ;;  %v582_v8 = vmul.f32 0.03125, %v561_v45  ;;  %640 = vadd.xlane.f32.xlu0 %v622_v4  ;;  %654 = vadd.xlane.f32.xlu1 %v629_v5  ;;  %v553_v13 = vpop.xlane.xlu0 %552 }
 0x20a   :  { %v578_v21 = vmul.f32 0.03125, %v553_v13 }
 0x20b   :  { %v599_v19 = vsub.f32 %v1526_v20, %v583_v12  ;;  %v598_v22 = vsub.f32 %v1516_v14, %v582_v8 }
 0x20c   :  { %v594_v51 = vsub.f32 %v1520_v9, %v578_v21 }
 0x20d   :  { %v1616_v25 = vsel %vm539_vm0, %v598_v22, 0.0  ;;  %v1620_v26 = vsel %vm539_vm0, %v599_v19, 0.0 }
 0x20e   :  { %v630_v43 = vmul.f32 %v1616_v25, %v1616_v25  ;;  %v1626_v30 = vsel %vm539_vm0, %v594_v51, 0.0  ;;  %v631_v14 = vmul.f32 %v1620_v26, %v1620_v26 }
 0x20f   :  { %v626_v9 = vmul.f32 %v1626_v30, %v1626_v30 }
 0x210   :  { %v569_v20 = vpop.xlane.xlu2 %568  ;;  %v547_v44 = vpop.xlane.xlu1 %546  ;;  %656 = vadd.xlane.f32.xlu2 %v630_v43 }
 0x211   :  { %v586_v15 = vmul.f32 0.03125, %v569_v20  ;;  %v575_v41 = vmul.f32 0.03125, %v547_v44  ;;  %658 = vadd.xlane.f32.xlu0 %v631_v14  ;;  %648 = vadd.xlane.f32.xlu1 %v626_v9  ;;  %v571_v46 = vpop.xlane.xlu0 %570 }
 0x212   :  { %v587_v33 = vmul.f32 0.03125, %v571_v46 }
 0x213   :  { %v602_v31 = vsub.f32 %v1533_v49, %v586_v15  ;;  %v591_v32 = vsub.f32 %v1542_v52, %v575_v41  ;;  %v585_v52 = vmul.f32 0.03125, %v567_v56 }
 0x214   :  { %v603_v37 = vsub.f32 %v1537_v27, %v587_v33 }
 0x215   :  { %v1636_v34 = vsel %vm539_vm0, %v602_v31, 0.0  ;;  %v1640_v35 = vsel %vm539_vm0, %v591_v32, 0.0  ;;  %v601_v27 = vsub.f32 %v1486_v59, %v585_v52 }
 0x216   :  { %v634_v36 = vmul.f32 %v1636_v34, %v1636_v34  ;;  %v623_v28 = vmul.f32 %v1640_v35, %v1640_v35  ;;  %v1650_v38 = vsel %vm539_vm0, %v603_v37, 0.0 }
 0x217   :  { %v635_v18 = vmul.f32 %v1650_v38, %v1650_v38 }
 0x218   :  { %v555_v49 = vpop.xlane.xlu1 %554 }
 0x219   :  { %v579_v29 = vmul.f32 0.03125, %v555_v49  ;;  %664 = vadd.xlane.f32.xlu0 %v634_v36  ;;  %642 = vadd.xlane.f32.xlu1 %v623_v28 }
 0x21b   :  { %v595_v11 = vsub.f32 %v1549_v54, %v579_v29  ;;  %v1663_v54 = vsel %vm539_vm0, %v601_v27, 0.0 }
 0x21c   :  { %v633_v56 = vmul.f32 %v1663_v54, %v1663_v54 }
 0x21d   :  { %v1654_v48 = vsel %vm539_vm0, %v595_v11, 0.0 }
 0x21e   :  { %v627_v53 = vmul.f32 %v1654_v48, %v1654_v48 }
 0x220   :  { %650 = vadd.xlane.f32.xlu2 %v627_v53 }
 0x221   :  { %666 = vadd.xlane.f32.xlu1 %v635_v18 }
 0x228   :  { %662 = vadd.xlane.f32.xlu2 %v633_v56 }
 0x264   :  { %v645_v16 = vpop.xlane.xlu2 %644  ;;  %v637_v39 = vpop.xlane.xlu1 %636 }
 0x265   :  { %v672_v57 = vmul.f32 0.03125, %v645_v16  ;;  %v668_v58 = vmul.f32 0.03125, %v637_v39 }
 0x267   :  { %v688_v23 = vadd.f32 1e-05, %v672_v57  ;;  %v684_v10 = vadd.f32 1e-05, %v668_v58 }
 0x269   :  { %1223 = vrsqrt.f32 %v688_v23  ;;  %vm746_vm2 = vweird.f32 %v688_v23  ;;  %vm706_vm5 = vweird.f32 %v684_v10 }
 0x26a   :  { %1225 = vrsqrt.f32 %v684_v10 }
 0x26c   :  { %v653_v59 = vpop.xlane.xlu0 %652  ;;  %v661_v1 = vpop.xlane.xlu1 %660 }
 0x26d   :  { %v676_v24 = vmul.f32 0.03125, %v653_v59  ;;  %v680_v14 = vmul.f32 0.03125, %v661_v1 }
 0x26f   :  { %v1667_v0 = vpop.eup %1223  ;;  %v1669_v17 = vadd.f32 1e-05, %v676_v24  ;;  %v1693_v36 = vadd.f32 1e-05, %v680_v14 }
 0x270   :  { %v1671_v55 = vpop.eup %1225  ;;  %v741_v60 = vmul.f32 %v1667_v0, %v688_v23  ;;  %vm747_vm1 = vweird.f32 %v1667_v0 }
 0x271   :  { %v701_v61 = vmul.f32 %v1671_v55, %v684_v10  ;;  %1227 = vrsqrt.f32 %v1669_v17  ;;  %vm707_vm3 = vweird.f32 %v1671_v55  ;;  %vm1705_vm4 = vmor %vm746_vm2, %vm747_vm1  ;;  %vm786_vm7 = vweird.f32 %v1669_v17 }
 0x272   :  { %v742_v6 = vmul.f32 %v1667_v0, %v741_v60  ;;  %vm1717_vm6 = vmor %vm706_vm5, %vm707_vm3 }
 0x273   :  { %v702_v4 = vmul.f32 %v1671_v55, %v701_v61 }
 0x274   :  { %v639_v5 = vpop.xlane.xlu2 %638  ;;  %v647_v7 = vpop.xlane.xlu0 %646  ;;  %v743_v8 = vmul.f32 0.5, %v742_v6 }
 0x275   :  { %v669_v45 = vmul.f32 0.03125, %v639_v5  ;;  %v673_v12 = vmul.f32 0.03125, %v647_v7  ;;  %v703_v22 = vmul.f32 0.5, %v702_v4 }
 0x276   :  { %v744_v43 = vsub.f32 1.5, %v743_v8 }
 0x277   :  { %v1678_v13 = vadd.f32 1e-05, %v669_v45  ;;  %v1680_v21 = vadd.f32 1e-05, %v673_v12  ;;  %v1682_v19 = vpop.eup %1227  ;;  %v704_v20 = vsub.f32 1.5, %v703_v22 }
 0x278   :  { %v781_v51 = vmul.f32 %v1682_v19, %v1669_v17  ;;  %v745_v31 = vmul.f32 %v1667_v0, %v744_v43  ;;  %vm787_vm8 = vweird.f32 %v1682_v19 }
 0x279   :  { %1229 = vrsqrt.f32 %v1678_v13  ;;  %v705_v29 = vmul.f32 %v1671_v55, %v704_v20  ;;  %vm716_vm9 = vweird.f32 %v1678_v13  ;;  %vm1751_vm12 = vmor %vm786_vm7, %vm787_vm8  ;;  %vm756_vm13 = vweird.f32 %v1680_v21 }
 0x27a   :  { %1231 = vrsqrt.f32 %v1680_v21  ;;  %v782_v9 = vmul.f32 %v1682_v19, %v781_v51  ;;  %v749_v27 = vsel %vm1705_vm4, %v1667_v0, %v745_v31  ;;  %v1732_v0 = vld [vmem:[%s1955_s6] ss:$0 sm:$0xff] }
 0x27b   :  { %v709_v58 = vsel %vm1717_vm6, %v1671_v55, %v705_v29  ;;  %v864_v60 = vmul.f32 %v749_v27, %v1559_v42 }
 0x27c   :  { %v655_v44 = vpop.xlane.xlu1 %654  ;;  %v641_v15 = vpop.xlane.xlu0 %640  ;;  %v783_v32 = vmul.f32 0.5, %v782_v9  ;;  %v860_v45 = vmul.f32 %v709_v58, %v1563_v50 }
 0x27d   :  { %v677_v41 = vmul.f32 0.03125, %v655_v44  ;;  %v670_v46 = vmul.f32 0.03125, %v641_v15  ;;  %v883_v9 = vmul.f32 %v1732_v0, %v864_v60 }
 0x27e   :  { %v784_v18 = vsub.f32 1.5, %v783_v32 }
 0x27f   :  { %v1691_v33 = vpop.eup %1229  ;;  %v1695_v28 = vadd.f32 1e-05, %v677_v41  ;;  %v1697_v37 = vadd.f32 1e-05, %v670_v46  ;;  %v879_v41 = vmul.f32 %v1732_v0, %v860_v45 }
 0x280   :  { %v1699_v49 = vpop.eup %1231  ;;  %v711_v52 = vmul.f32 %v1691_v33, %v1678_v13  ;;  %v785_v4 = vmul.f32 %v1682_v19, %v784_v18  ;;  %vm717_vm10 = vweird.f32 %v1691_v33 }
 0x281   :  { %v751_v53 = vmul.f32 %v1699_v49, %v1680_v21  ;;  %1233 = vrsqrt.f32 %v1695_v28  ;;  %vm757_vm11 = vweird.f32 %v1699_v49  ;;  %vm718_vm14 = vmor %vm716_vm9, %vm717_vm10  ;;  %v1775_v21 = vld [vmem:[%s1956_s7] ss:$0 sm:$0xff]  ;;  %vm796_vm1 = vweird.f32 %v1695_v28 }
 0x282   :  { %v712_v56 = vmul.f32 %v1691_v33, %v711_v52  ;;  %1235 = vrsqrt.f32 %v1697_v37  ;;  %v789_v44 = vsel %vm1751_vm12, %v1682_v19, %v785_v4  ;;  %vm758_vm15 = vmor %vm756_vm13, %vm757_vm11  ;;  %vm726_vm8 = vweird.f32 %v1697_v37 }
 0x283   :  { %1237 = vrsqrt.f32 %v1693_v36  ;;  %v752_v39 = vmul.f32 %v1699_v49, %v751_v53  ;;  %v657_v57 = vpop.xlane.xlu2 %656  ;;  %v868_v53 = vmul.f32 %v789_v44, %v1573_v40 }
 0x284   :  { %v713_v23 = vmul.f32 0.5, %v712_v56  ;;  %v678_v10 = vmul.f32 0.03125, %v657_v57  ;;  %v649_v59 = vpop.xlane.xlu1 %648  ;;  %v659_v24 = vpop.xlane.xlu0 %658 }
 0x285   :  { %v753_v61 = vmul.f32 0.5, %v752_v39  ;;  %v674_v6 = vmul.f32 0.03125, %v649_v59  ;;  %v679_v1 = vmul.f32 0.03125, %v659_v24  ;;  %v887_v60 = vmul.f32 %v1732_v0, %v868_v53 }
 0x286   :  { %v714_v5 = vsub.f32 1.5, %v713_v23  ;;  %v1737_v55 = vadd.f32 1e-05, %v678_v10 }
 0x287   :  { %v1739_v7 = vpop.eup %1233  ;;  %v754_v12 = vsub.f32 1.5, %v753_v61  ;;  %v1743_v8 = vadd.f32 1e-05, %v674_v6  ;;  %v1759_v43 = vadd.f32 1e-05, %v679_v1 }
 0x288   :  { %v1745_v42 = vpop.eup %1235  ;;  %v715_v51 = vmul.f32 %v1691_v33, %v714_v5  ;;  %v791_v50 = vmul.f32 %v1739_v7, %v1695_v28  ;;  %1239 = vrsqrt.f32 %v1737_v55  ;;  %vm797_vm0 = vweird.f32 %v1739_v7 }
 0x289   :  { %v1761_v14 = vpop.eup %1237  ;;  %v755_v17 = vmul.f32 %v1699_v49, %v754_v12  ;;  %v721_v20 = vmul.f32 %v1745_v42, %v1697_v37  ;;  %1241 = vrsqrt.f32 %v1743_v8  ;;  %vm798_vm2 = vmor %vm796_vm1, %vm797_vm0  ;;  %vm727_vm3 = vweird.f32 %v1745_v42 }
 0x28a   :  { %v719_v15 = vsel %vm718_vm14, %v1691_v33, %v715_v51  ;;  %v792_v13 = vmul.f32 %v1739_v7, %v791_v50  ;;  %v821_v19 = vmul.f32 %v1761_v14, %v1693_v36  ;;  %1243 = vrsqrt.f32 %v1759_v43  ;;  %vm1844_vm9 = vmor %vm726_vm8, %vm727_vm3 }
 0x28b   :  { %v861_v46 = vmul.f32 %v719_v15, %v1591_v63  ;;  %v759_v31 = vsel %vm758_vm15, %v1699_v49, %v755_v17  ;;  %v722_v32 = vmul.f32 %v1745_v42, %v721_v20  ;;  %v902_v49 = vadd.f32 %v1775_v21, %v883_v9 }
 0x28c   :  { %v865_v33 = vmul.f32 %v759_v31, %v1587_v62  ;;  %v793_v29 = vmul.f32 0.5, %v792_v13  ;;  %v643_v52 = vpop.xlane.xlu1 %642  ;;  %v665_v11 = vpop.xlane.xlu0 %664  ;;  %v898_v62 = vadd.f32 %v1775_v21, %v879_v41  ;;  %v822_v9 = vmul.f32 %v1761_v14, %v821_v19 }
 0x28d   :  { %v880_v27 = vmul.f32 %v1732_v0, %v861_v46  ;;  %v671_v18 = vmul.f32 0.03125, %v643_v52  ;;  %v682_v63 = vmul.f32 0.03125, %v665_v11  ;;  %v723_v58 = vmul.f32 0.5, %v722_v32 }
 0x28e   :  { %v884_v56 = vmul.f32 %v1732_v0, %v865_v33  ;;  %v794_v16 = vsub.f32 1.5, %v793_v29  ;;  %v1240_v39 = vpop.eup %1239  ;;  %v906_v20 = vadd.f32 %v1775_v21, %v887_v60  ;;  %vm806_vm5 = vweird.f32 %v1737_v55 }
 0x28f   :  { %v899_v57 = vadd.f32 %v1775_v21, %v880_v27  ;;  %v1800_v23 = vadd.f32 1e-05, %v671_v18  ;;  %v1802_v40 = vpop.eup %1241  ;;  %v801_v24 = vmul.f32 %v1240_v39, %v1737_v55  ;;  %v1811_v1 = vadd.f32 1e-05, %v682_v63 }
 0x290   :  { %v903_v10 = vadd.f32 %v1775_v21, %v884_v56  ;;  %v795_v59 = vmul.f32 %v1739_v7, %v794_v16  ;;  %v761_v6 = vmul.f32 %v1802_v40, %v1743_v8  ;;  %v1244_v4 = vpop.eup %1243  ;;  %v724_v22 = vsub.f32 1.5, %v723_v58 }
 0x291   :  { %v1120_v61 = vpack.c.bf16 %v899_v57, %v898_v62  ;;  %v802_v12 = vmul.f32 %v1240_v39, %v801_v24  ;;  %1245 = vrsqrt.f32 %v1800_v23  ;;  %v811_v51 = vmul.f32 %v1244_v4, %v1759_v43 }
 0x292   :  { %v1130_v5 = vpack.c.bf16 %v903_v10, %v902_v49  ;;  %v799_v45 = vsel %vm798_vm2, %v1739_v7, %v795_v59  ;;  %v762_v17 = vmul.f32 %v1802_v40, %v761_v6  ;;  %1247 = vrsqrt.f32 %v1811_v1 }
 0x293   :  { %1121 = vst [vmem:[%s1957_s8] sm:$0xff] %v1120_v61   ;;  %v869_v28 = vmul.f32 %v799_v45, %v1605_v3  ;;  %v651_v50 = vpop.xlane.xlu2 %650  ;;  %v803_v7 = vmul.f32 0.5, %v802_v12  ;;  %v812_v15 = vmul.f32 %v1244_v4, %v811_v51  ;;  %vm807_vm4 = vweird.f32 %v1240_v39 }
 0x294   :  { %1165 = vst [vmem:[%s1957_s8 + $0x10] sm:$0xff] %v1130_v5   ;;  %v667_v3 = vpop.xlane.xlu1 %666  ;;  %v675_v41 = vmul.f32 0.03125, %v651_v50  ;;  %v725_v31 = vmul.f32 %v1745_v42, %v724_v22  ;;  %v763_v29 = vmul.f32 0.5, %v762_v17  ;;  %vm808_vm6 = vmor %vm806_vm5, %vm807_vm4  ;;  %vm817_vm7 = vweird.f32 %v1244_v4 }
 0x295   :  { %v888_v44 = vmul.f32 %v1732_v0, %v869_v28  ;;  %v804_v13 = vsub.f32 1.5, %v803_v7  ;;  %v813_v32 = vmul.f32 0.5, %v812_v15  ;;  %v683_v11 = vmul.f32 0.03125, %v667_v3 }
 0x296   :  { %v1832_v52 = vadd.f32 1e-05, %v675_v41  ;;  %vm816_vm10 = vweird.f32 %v1759_v43  ;;  %v823_v62 = vmul.f32 0.5, %v822_v9  ;;  %v764_v57 = vsub.f32 1.5, %v763_v29 }
 0x297   :  { %v907_v46 = vadd.f32 %v1775_v21, %v888_v44  ;;  %v1246_v19 = vpop.eup %1245  ;;  %v805_v33 = vmul.f32 %v1240_v39, %v804_v13  ;;  %v814_v27 = vsub.f32 1.5, %v813_v32  ;;  %vm818_vm11 = vmor %vm816_vm10, %vm817_vm7  ;;  %v1853_v10 = vadd.f32 1e-05, %v683_v11 }
 0x298   :  { %v731_v18 = vmul.f32 %v1246_v19, %v1800_v23  ;;  %1249 = vrsqrt.f32 %v1832_v52  ;;  %v1837_v49 = vpop.eup %1247  ;;  %v729_v59 = vsel %vm1844_vm9, %v1745_v42, %v725_v31  ;;  %vm767_vm12 = vweird.f32 %v1802_v40 }
 0x299   :  { %v1140_v53 = vpack.c.bf16 %v907_v46, %v906_v20  ;;  %v809_v63 = vsel %vm808_vm6, %v1240_v39, %v805_v33  ;;  %v815_v16 = vmul.f32 %v1244_v4, %v814_v27  ;;  %v841_v58 = vmul.f32 %v1837_v49, %v1811_v1 }
 0x29a   :  { %v870_v56 = vmul.f32 %v809_v63, %v1616_v25  ;;  %v732_v37 = vmul.f32 %v1246_v19, %v731_v18  ;;  %1251 = vrsqrt.f32 %v1853_v10  ;;  %vm737_vm13 = vweird.f32 %v1246_v19 }
 0x29b   :  { %1167 = vst [vmem:[%s1957_s8 + $0x20] sm:$0xff] %v1140_v53   ;;  %v663_v39 = vpop.xlane.xlu2 %662  ;;  %v819_v24 = vsel %vm818_vm11, %v1244_v4, %v815_v16  ;;  %v842_v6 = vmul.f32 %v1837_v49, %v841_v58  ;;  %v862_v42 = vmul.f32 %v729_v59, %v1601_v2  ;;  %v765_v4 = vmul.f32 %v1802_v40, %v764_v57 }
 0x29c   :  { %v733_v25 = vmul.f32 0.5, %v732_v37  ;;  %v681_v60 = vmul.f32 0.03125, %v663_v39  ;;  %v889_v43 = vmul.f32 %v1732_v0, %v870_v56  ;;  %v871_v61 = vmul.f32 %v819_v24, %v1620_v26 }
 0x29d   :  { %v843_v22 = vmul.f32 0.5, %v842_v6  ;;  %vm736_vm14 = vweird.f32 %v1800_v23  ;;  %vm766_vm15 = vweird.f32 %v1743_v8  ;;  %v824_v7 = vsub.f32 1.5, %v823_v62 }
 0x29e   :  { %v734_v5 = vsub.f32 1.5, %v733_v25  ;;  %v1863_v45 = vadd.f32 1e-05, %v681_v60  ;;  %v1250_v12 = vpop.eup %1249  ;;  %v890_v28 = vmul.f32 %v1732_v0, %v871_v61  ;;  %v908_v50 = vadd.f32 %v1775_v21, %v889_v43  ;;  %vm738_vm0 = vmor %vm736_vm14, %vm737_vm13 }
 0x29f   :  { %v771_v26 = vmul.f32 %v1250_v12, %v1832_v52  ;;  %v844_v2 = vsub.f32 1.5, %v843_v22  ;;  %vm1876_vm1 = vmor %vm766_vm15, %vm767_vm12  ;;  %v881_v15 = vmul.f32 %v1732_v0, %v862_v42  ;;  %vm847_vm2 = vweird.f32 %v1837_v49 }
 0x2a0   :  { %v735_v51 = vmul.f32 %v1246_v19, %v734_v5  ;;  %1253 = vrsqrt.f32 %v1863_v45  ;;  %v909_v9 = vadd.f32 %v1775_v21, %v890_v28  ;;  %v1252_v44 = vpop.eup %1251  ;;  %v769_v8 = vsel %vm1876_vm1, %v1802_v40, %v765_v4 }
 0x2a1   :  { %v772_v20 = vmul.f32 %v1250_v12, %v771_v26  ;;  %v845_v41 = vmul.f32 %v1837_v49, %v844_v2  ;;  %v851_v31 = vmul.f32 %v1252_v44, %v1853_v10  ;;  %vm827_vm3 = vweird.f32 %v1761_v14 }
 0x2a2   :  { %v739_v23 = vsel %vm738_vm0, %v1246_v19, %v735_v51  ;;  %v1145_v3 = vpack.c.bf16 %v909_v9, %v908_v50  ;;  %vm846_vm4 = vweird.f32 %v1811_v1  ;;  %vm777_vm5 = vweird.f32 %v1250_v12 }
 0x2a3   :  { %v863_v13 = vmul.f32 %v739_v23, %v1640_v35  ;;  %v773_v46 = vmul.f32 0.5, %v772_v20  ;;  %v866_v35 = vmul.f32 %v769_v8, %v1626_v30  ;;  %v852_v33 = vmul.f32 %v1252_v44, %v851_v31  ;;  %vm1900_vm6 = vmor %vm846_vm4, %vm847_vm2 }
 0x2a4   :  { %1168 = vst [vmem:[%s1957_s8 + $0x28] sm:$0xff] %v1145_v3   ;;  %v825_v29 = vmul.f32 %v1761_v14, %v824_v7  ;;  %v900_v11 = vadd.f32 %v1775_v21, %v881_v15  ;;  %v849_v30 = vsel %vm1900_vm6, %v1837_v49, %v845_v41  ;;  %vm776_vm7 = vweird.f32 %v1832_v52 }
 0x2a5   :  { %v882_v32 = vmul.f32 %v1732_v0, %v863_v13  ;;  %v774_v19 = vsub.f32 1.5, %v773_v46  ;;  %v853_v63 = vmul.f32 0.5, %v852_v33  ;;  %vm826_vm8 = vweird.f32 %v1693_v36  ;;  %vm778_vm9 = vmor %vm776_vm7, %vm777_vm5 }
 0x2a6   :  { %v1254_v40 = vpop.eup %1253  ;;  %vm1912_vm10 = vmor %vm826_vm8, %vm827_vm3  ;;  %v885_v37 = vmul.f32 %v1732_v0, %v866_v35  ;;  %vm857_vm11 = vweird.f32 %v1252_v44  ;;  %v874_v36 = vmul.f32 %v849_v30, %v1636_v34  ;;  %vm856_vm12 = vweird.f32 %v1853_v10 }
 0x2a7   :  { %v901_v53 = vadd.f32 %v1775_v21, %v882_v32  ;;  %v831_v1 = vmul.f32 %v1254_v40, %v1863_v45  ;;  %v775_v18 = vmul.f32 %v1250_v12, %v774_v19  ;;  %v854_v62 = vsub.f32 1.5, %v853_v63  ;;  %vm858_vm13 = vmor %vm856_vm12, %vm857_vm11 }
 0x2a8   :  { %v829_v52 = vsel %vm1912_vm10, %v1761_v14, %v825_v29  ;;  %vm837_vm14 = vweird.f32 %v1254_v40  ;;  %v904_v14 = vadd.f32 %v1775_v21, %v885_v37  ;;  %vm836_vm15 = vweird.f32 %v1863_v45 }
 0x2a9   :  { %v1125_v55 = vpack.c.bf16 %v901_v53, %v900_v11  ;;  %v832_v56 = vmul.f32 %v1254_v40, %v831_v1  ;;  %v779_v39 = vsel %vm778_vm9, %v1250_v12, %v775_v18  ;;  %v855_v58 = vmul.f32 %v1252_v44, %v854_v62  ;;  %vm838_vm0 = vmor %vm836_vm15, %vm837_vm14 }
 0x2aa   :  { %v867_v49 = vmul.f32 %v779_v39, %v1654_v48  ;;  %v872_v25 = vmul.f32 %v829_v52, %v1577_v47  ;;  %v893_v34 = vmul.f32 %v1732_v0, %v874_v36 }
 0x2ab   :  { %1164 = vst [vmem:[%s1957_s8 + $0x8] sm:$0xff] %v1125_v55   ;;  %v833_v57 = vmul.f32 0.5, %v832_v56  ;;  %v859_v60 = vsel %vm858_vm13, %v1252_v44, %v855_v58 }
 0x2ac   :  { %v886_v59 = vmul.f32 %v1732_v0, %v867_v49  ;;  %v875_v43 = vmul.f32 %v859_v60, %v1650_v38  ;;  %v891_v12 = vmul.f32 %v1732_v0, %v872_v25  ;;  %v912_v42 = vadd.f32 %v1775_v21, %v893_v34 }
 0x2ad   :  { %v834_v24 = vsub.f32 1.5, %v833_v57 }
 0x2ae   :  { %v905_v48 = vadd.f32 %v1775_v21, %v886_v59  ;;  %v894_v6 = vmul.f32 %v1732_v0, %v875_v43  ;;  %v910_v28 = vadd.f32 %v1775_v21, %v891_v12 }
 0x2af   :  { %v835_v61 = vmul.f32 %v1254_v40, %v834_v24 }
 0x2b0   :  { %v1135_v10 = vpack.c.bf16 %v905_v48, %v904_v14  ;;  %v913_v45 = vadd.f32 %v1775_v21, %v894_v6 }
 0x2b1   :  { %v839_v5 = vsel %vm838_vm0, %v1254_v40, %v835_v61 }
 0x2b2   :  { %v873_v47 = vmul.f32 %v839_v5, %v1663_v54  ;;  %1166 = vst [vmem:[%s1957_s8 + $0x18] sm:$0xff] %v1135_v10   ;;  %v1155_v4 = vpack.c.bf16 %v913_v45, %v912_v42 }
 0x2b4   :  { %v892_v38 = vmul.f32 %v1732_v0, %v873_v47  ;;  %1170 = vst [vmem:[%s1957_s8 + $0x38] sm:$0xff] %v1155_v4  }
 0x2b6   :  { %v911_v22 = vadd.f32 %v1775_v21, %v892_v38 }
 0x2b8   :  { %v1150_v54 = vpack.c.bf16 %v911_v22, %v910_v28 }
 0x2ba   :  { %1169 = vst [vmem:[%s1957_s8 + $0x30] sm:$0xff] %v1150_v54  }

</bundles_post_ra>
